<compile_context>
chip_gen: v7x
topology: tpu7x:2x2x1
jax: 0.10.0
libtpu: 0.0.40
codegen_flags: <defaults>
</compile_context>

<pallas_src>
import functools

import numpy as np
import jax
import jax.numpy as jnp
from jax.experimental import pallas as pl
from jax.experimental.pallas import tpu as pltpu

L_IN = 64
N_CLASSES = 14
N_OUT_PAD = 128          # lane-dense padded logits width
_BATCH_TILE = 512        # multiple of 8; fits comfortably with vmem_limit_bytes below

_DEVICE_KIND = jax.devices()[0].device_kind.lower()
_IS_2TC = ("v7" in _DEVICE_KIND) or ("7x" in _DEVICE_KIND)           # v7x: 2 TensorCores/chip
_USE_BF16_EW = ("v6" in _DEVICE_KIND) or _IS_2TC                     # bf16 VPU on v6e/v7x only


def _fused_kernel(x_ref, w1_ref, b1_ref, weo_ref, b2_ref,
                  lw1_ref, lb1_ref, lw3_ref, lb3_ref, lw4_ref, lb4_ref,
                  lw5_ref, lb5_ref, out_ref, *, ew_dtype):
    f32 = jnp.float32
    bf16 = jnp.bfloat16

    x = x_ref[...].astype(bf16)                                          # (TB, 64) bf16

    # conv1 (+bias) for all four (t mod 4) phases as one MXU matmul.
    # Column blocks are host-packed in phase order (k0, k2 | k1, k3).
    r1 = (jnp.dot(x, w1_ref[...], preferred_element_type=f32)
          + b1_ref[...]).astype(ew_dtype)                                # (TB, 1024)

    # maxpool1 + ReLU (relu(max)==max(relu)); result lanes = [p1_even | p1_odd], lane = u*16 + c.
    p1 = jnp.maximum(jnp.maximum(r1[:, 0:512], r1[:, 512:1024]), 0.0).astype(bf16)   # (TB, 512)

    # conv2 (+bias) as a single K=512 matmul; columns = [c2(t even) | c2(t odd)], lane = v*16 + co.
    c2 = (jnp.dot(p1, weo_ref[...], preferred_element_type=f32)
          + b2_ref[...]).astype(ew_dtype)                                # (TB, 512)

    # maxpool2 + ReLU -> flattened feature slab (lane = v*16 + c; lw1 rows pre-permuted to match).
    feat = jnp.maximum(jnp.maximum(c2[:, 0:256], c2[:, 256:512]), 0.0).astype(bf16)  # (TB, 256)

    h = (jnp.dot(feat, lw1_ref[...], preferred_element_type=f32) + lb1_ref[...]).astype(ew_dtype)
    h = jnp.maximum(h, 0.0).astype(bf16)
    h = (jnp.dot(h, lw3_ref[...], preferred_element_type=f32) + lb3_ref[...]).astype(ew_dtype)
    h = jnp.maximum(h, 0.0).astype(bf16)
    h = (jnp.dot(h, lw4_ref[...], preferred_element_type=f32) + lb4_ref[...]).astype(ew_dtype)
    h = jnp.maximum(h, 0.0).astype(bf16)

    # Final layer padded to 128 lanes (pad columns zero, pad bias -1e30 -> exp underflows to 0).
    logits = jnp.dot(h, lw5_ref[...], preferred_element_type=f32) + lb5_ref[...]     # (TB, 128) f32

    # log_softmax (max-stabilized) over the full 128-lane slab; pad lanes do not perturb rows 0..13.
    z = logits - jnp.max(logits, axis=1, keepdims=True)
    out_ref[...] = z - jnp.log(jnp.sum(jnp.exp(z), axis=1, keepdims=True))


def init_torch_params(key):
    """Torch-layout parameters (Conv1d / Linear shapes), torch-default-like uniform init."""
    def uniform(k, shape, fan_in):
        bound = 1.0 / np.sqrt(fan_in)
        return jax.random.uniform(k, shape, jnp.float32, -bound, bound)

    ks = jax.random.split(key, 12)
    return {
        "conv1_w": uniform(ks[0], (16, 1, 2), 2),     "conv1_b": uniform(ks[1], (16,), 2),
        "conv2_w": uniform(ks[2], (16, 16, 2), 32),   "conv2_b": uniform(ks[3], (16,), 32),
        "l1_w": uniform(ks[4], (512, 240), 240),      "l1_b": uniform(ks[5], (512,), 240),
        "l3_w": uniform(ks[6], (256, 512), 512),      "l3_b": uniform(ks[7], (256,), 512),
        "l4_w": uniform(ks[8], (128, 256), 256),      "l4_b": uniform(ks[9], (128,), 256),
        "l5_w": uniform(ks[10], (14, 128), 128),      "l5_b": uniform(ks[11], (14,), 128),
    }


def pack_params(tp):
    """Host-side packing of torch params into the matmul-ified kernel weights."""
    w1 = np.asarray(tp["conv1_w"], np.float32)   # (16,1,2)
    b1 = np.asarray(tp["conv1_b"], np.float32)   # (16,)
    w2 = np.asarray(tp["conv2_w"], np.float32)   # (16,16,2)
    b2 = np.asarray(tp["conv2_b"], np.float32)   # (16,)

    # conv1 as x(64) -> 1024 lanes. Phase k (t = 4u+k) goes to column block k2blk[k], so that
    # pool1 in-kernel is a single max(r1[:, :512], r1[:, 512:]) -> [p1_even | p1_odd].
    k2blk = {0: 0, 2: 1, 1: 2, 3: 3}
    W1 = np.zeros((64, 1024), np.float32)
    B1 = np.zeros((1, 1024), np.float32)
    for k in range(4):
        for u in range(16):
            t = 4 * u + k
            if t > 62:               # conv1 output length is 63 (t=0..62); k=3,u=15 is invalid
                continue
            cols = k2blk[k] * 256 + u * 16 + np.arange(16)
            W1[t, cols] = w1[:, 0, 0]
            W1[t + 1, cols] = w1[:, 0, 1]
            B1[0, cols] = b1

    # conv2 as one (512,512) matmul: rows [p1_even | p1_odd], cols [c2(t even) | c2(t odd)],
    # lane-in-half = v*16 + co. The p1[t+1] shift is folded into the even-row block.
    WEO = np.zeros((512, 512), np.float32)
    B2 = np.zeros((1, 512), np.float32)
    w2a_t = w2[:, :, 0].T            # (ci, co)
    w2b_t = w2[:, :, 1].T
    E, O = 0, 256                    # row offsets of p1_even / p1_odd inside the p1 slab
    for v in range(15):              # conv2 output pairs (2v, 2v+1), v=0..14
        rows_v = v * 16 + np.arange(16)
        rows_v1 = (v + 1) * 16 + np.arange(16)
        cols_e = v * 16 + np.arange(16)
        cols_o = 256 + v * 16 + np.arange(16)
        # c2[2v]   = w2a . p1[2v]   + w2b . p1[2v+1] + b2
        WEO[np.ix_(E + rows_v, cols_e)] = w2a_t
        WEO[np.ix_(O + rows_v, cols_e)] = w2b_t
        # c2[2v+1] = w2a . p1[2v+1] + w2b . p1[2v+2] + b2
        WEO[np.ix_(O + rows_v, cols_o)] = w2a_t
        WEO[np.ix_(E + rows_v1, cols_o)] = w2b_t
        B2[0, cols_e] = b2
        B2[0, cols_o] = b2

    # l1 with torch's channel-major flatten folded in: kernel lane v*16+c  <->  torch feature c*15+v.
    l1w = np.asarray(tp["l1_w"], np.float32)     # (512, 240) = (out, in)
    LW1 = np.zeros((256, 512), np.float32)       # rows 240..255 stay zero (mask invalid lanes)
    for v in range(15):
        for c in range(16):
            LW1[v * 16 + c, :] = l1w[:, c * 15 + v]

    # l5 padded to 128 output lanes: pad weight columns zero, pad bias -1e30 (finite, not -inf).
    l5w = np.asarray(tp["l5_w"], np.float32)     # (14, 128)
    l5b = np.asarray(tp["l5_b"], np.float32)
    LW5 = np.zeros((128, N_OUT_PAD), np.float32)
    LW5[:, :N_CLASSES] = l5w.T
    LB5 = np.full((1, N_OUT_PAD), -1e30, np.float32)
    LB5[0, :N_CLASSES] = l5b

    def mat(w):   # torch (out, in) -> (in, out), bf16 for the MXU
        return jnp.asarray(np.asarray(w, np.float32).T, dtype=jnp.bfloat16)

    def vec(b):   # bias as (1, n) f32
        return jnp.asarray(np.asarray(b, np.float32)[None, :], dtype=jnp.float32)

    return (
        jnp.asarray(W1, jnp.bfloat16), jnp.asarray(B1, jnp.float32),
        jnp.asarray(WEO, jnp.bfloat16), jnp.asarray(B2, jnp.float32),
        jnp.asarray(LW1, jnp.bfloat16), vec(tp["l1_b"]),
        mat(tp["l3_w"]), vec(tp["l3_b"]),
        mat(tp["l4_w"]), vec(tp["l4_b"]),
        jnp.asarray(LW5, jnp.bfloat16), jnp.asarray(LB5, jnp.float32),
    )


@jax.jit
def fl_model_forward(x, packed):
    B = x.shape[0]
    assert x.shape[1] == L_IN
    x = x.astype(jnp.bfloat16)           # MXU input is bf16 anyway; halves the x HBM->VMEM bytes

    tb = min(B, _BATCH_TILE)
    # On 2-TC chips (v7x), make sure there are >=2 batch blocks so both cores get work.
    if _IS_2TC and tb == B and B >= 32 and B % 32 == 0:
        tb = B // 2
    nblk = pl.cdiv(B, tb)

    def act_spec(cols):
        return pl.BlockSpec((tb, cols), lambda i: (i, 0))

    def weight_spec(shape):
        return pl.BlockSpec(shape, lambda i: (0, 0))   # VMEM-resident across all batch tiles

    kernel = functools.partial(
        _fused_kernel,
        ew_dtype=jnp.bfloat16 if _USE_BF16_EW else jnp.float32)  # f32 elementwise on v5e

    out = pl.pallas_call(
        kernel,
        out_shape=jax.ShapeDtypeStruct((B, N_OUT_PAD), jnp.float32),
        grid=(nblk,),
        in_specs=[act_spec(L_IN)] + [weight_spec(w.shape) for w in packed],
        out_specs=act_spec(N_OUT_PAD),
        compiler_params=pltpu.CompilerParams(
            dimension_semantics=("parallel",),
            vmem_limit_bytes=64 << 20),   # v5e default scoped VMEM (16 MiB) is too small for TB=512
    )(x, *packed)
    return out[:, :N_CLASSES]


def reference_forward(x, tp):
    """Pure-JAX f32 reference matching the torch module exactly."""
    wa = tp["conv1_w"][:, 0, 0]
    wb = tp["conv1_w"][:, 0, 1]
    c1 = (x[:, None, 0:63] * wa[None, :, None]
          + x[:, None, 1:64] * wb[None, :, None]
          + tp["conv1_b"][None, :, None])
    c1 = jnp.maximum(c1, 0.0)                                       # (B,16,63)
    p1 = jnp.maximum(c1[:, :, 0:62:2], c1[:, :, 1:62:2])            # (B,16,31)
    c2 = (jnp.einsum('oc,bct->bot', tp["conv2_w"][:, :, 0], p1[:, :, 0:30])
          + jnp.einsum('oc,bct->bot', tp["conv2_w"][:, :, 1], p1[:, :, 1:31])
          + tp["conv2_b"][None, :, None])
    c2 = jnp.maximum(c2, 0.0)                                       # (B,16,30)
    p2 = jnp.maximum(c2[:, :, 0:30:2], c2[:, :, 1:30:2])            # (B,16,15)
    h = p2.reshape(x.shape[0], 240)                                 # channel-major, like torch .view
    h = jnp.maximum(h @ tp["l1_w"].T + tp["l1_b"], 0.0)
    h = jnp.maximum(h @ tp["l3_w"].T + tp["l3_b"], 0.0)
    h = jnp.maximum(h @ tp["l4_w"].T + tp["l4_b"], 0.0)
    logits = h @ tp["l5_w"].T + tp["l5_b"]
    return jax.nn.log_softmax(logits, axis=1)


if __name__ == "__main__":
    key = jax.random.PRNGKey(0)
    kx, kp = jax.random.split(key)
    B = 2
    x = jax.random.normal(kx, (B, L_IN), dtype=jnp.float32)

    tparams = init_torch_params(kp)
    packed = pack_params(tparams)

    out = fl_model_forward(x, packed)
    out = jax.block_until_ready(out)

    assert out.shape == (B, N_CLASSES)
    # log_softmax rows must exponentiate-sum to ~1
    assert bool(jnp.allclose(jnp.sum(jnp.exp(out), axis=1), 1.0, atol=1e-4))
    # match the f32 reference (bf16 matmul operands -> loose tolerance)
    ref = reference_forward(x, tparams)
    assert bool(jnp.allclose(out, ref, atol=5e-2)), float(jnp.max(jnp.abs(out - ref)))
    print("KERNEL_OK")
</pallas_src>

<mosaic_0001>
module attributes {stable_mosaic.version = 11 : i64} {
  func.func @_fused_kernel(%arg0: i32, %arg1: memref<2x64xbf16, #tpu.memory_space<vmem>>, %arg2: memref<64x1024xbf16, #tpu.memory_space<vmem>>, %arg3: memref<1x1024xf32, #tpu.memory_space<vmem>>, %arg4: memref<512x512xbf16, #tpu.memory_space<vmem>>, %arg5: memref<1x512xf32, #tpu.memory_space<vmem>>, %arg6: memref<256x512xbf16, #tpu.memory_space<vmem>>, %arg7: memref<1x512xf32, #tpu.memory_space<vmem>>, %arg8: memref<512x256xbf16, #tpu.memory_space<vmem>>, %arg9: memref<1x256xf32, #tpu.memory_space<vmem>>, %arg10: memref<256x128xbf16, #tpu.memory_space<vmem>>, %arg11: memref<1x128xf32, #tpu.memory_space<vmem>>, %arg12: memref<128x128xbf16, #tpu.memory_space<vmem>>, %arg13: memref<1x128xf32, #tpu.memory_space<vmem>>, %arg14: memref<2x128xf32, #tpu.memory_space<vmem>>) attributes {dimension_semantics = [#tpu.dimension_semantics<parallel>], iteration_bounds = array<i64: 1>, scalar_prefetch = 0 : i64, scratch_operands = 0 : i64, tpu.core_type = #tpu.core_type<tc>, window_params = [{transform_indices = @transform_0, window_bounds = array<i64: 2, 64>}, {pipeline_mode = #tpu.pipeline_mode<synchronous>, transform_indices = @transform_1, window_bounds = array<i64: 64, 1024>}, {pipeline_mode = #tpu.pipeline_mode<synchronous>, transform_indices = @transform_2, window_bounds = array<i64: 1, 1024>}, {pipeline_mode = #tpu.pipeline_mode<synchronous>, transform_indices = @transform_3, window_bounds = array<i64: 512, 512>}, {pipeline_mode = #tpu.pipeline_mode<synchronous>, transform_indices = @transform_4, window_bounds = array<i64: 1, 512>}, {pipeline_mode = #tpu.pipeline_mode<synchronous>, transform_indices = @transform_5, window_bounds = array<i64: 256, 512>}, {pipeline_mode = #tpu.pipeline_mode<synchronous>, transform_indices = @transform_6, window_bounds = array<i64: 1, 512>}, {pipeline_mode = #tpu.pipeline_mode<synchronous>, transform_indices = @transform_7, window_bounds = array<i64: 512, 256>}, {pipeline_mode = #tpu.pipeline_mode<synchronous>, transform_indices = @transform_8, window_bounds = array<i64: 1, 256>}, {pipeline_mode = #tpu.pipeline_mode<synchronous>, transform_indices = @transform_9, window_bounds = array<i64: 256, 128>}, {pipeline_mode = #tpu.pipeline_mode<synchronous>, transform_indices = @transform_10, window_bounds = array<i64: 1, 128>}, {pipeline_mode = #tpu.pipeline_mode<synchronous>, transform_indices = @transform_11, window_bounds = array<i64: 128, 128>}, {pipeline_mode = #tpu.pipeline_mode<synchronous>, transform_indices = @transform_12, window_bounds = array<i64: 1, 128>}, {transform_indices = @transform_13, window_bounds = array<i64: 2, 128>}]} {
    %c0 = arith.constant 0 : index
    %c0_0 = arith.constant 0 : index
    %0 = vector.load %arg1[%c0, %c0_0] : memref<2x64xbf16, #tpu.memory_space<vmem>>, vector<2x64xbf16>
    %c0_1 = arith.constant 0 : index
    %c0_2 = arith.constant 0 : index
    %1 = vector.load %arg2[%c0_1, %c0_2] : memref<64x1024xbf16, #tpu.memory_space<vmem>>, vector<64x1024xbf16>
    %cst = arith.constant dense<0.000000e+00> : vector<2x1024xf32>
    %2 = tpu.matmul %0, %1, %cst {dimension_numbers = #tpu.dot_dimension_numbers<[1], [0], [0], [1], [0, 0, 1, 1], [], []>} : vector<2x64xbf16>, vector<64x1024xbf16>, vector<2x1024xf32> -> vector<2x1024xf32>
    %c0_3 = arith.constant 0 : index
    %c0_4 = arith.constant 0 : index
    %3 = vector.load %arg3[%c0_3, %c0_4] : memref<1x1024xf32, #tpu.memory_space<vmem>>, vector<1x1024xf32>
    %4 = vector.broadcast %3 : vector<1x1024xf32> to vector<2x1024xf32>
    %5 = arith.addf %2, %4 : vector<2x1024xf32>
    %6 = vector.extract_strided_slice %5 {offsets = [0, 0], sizes = [2, 512], strides = [1, 1]} : vector<2x1024xf32> to vector<2x512xf32>
    %7 = vector.extract_strided_slice %5 {offsets = [0, 512], sizes = [2, 512], strides = [1, 1]} : vector<2x1024xf32> to vector<2x512xf32>
    %8 = arith.maximumf %6, %7 : vector<2x512xf32>
    %cst_5 = arith.constant 0.000000e+00 : f32
    %9 = vector.broadcast %cst_5 : f32 to vector<2x512xf32>
    %10 = arith.maximumf %8, %9 : vector<2x512xf32>
    %11 = arith.truncf %10 : vector<2x512xf32> to vector<2x512xbf16>
    %c0_6 = arith.constant 0 : index
    %c0_7 = arith.constant 0 : index
    %12 = vector.load %arg4[%c0_6, %c0_7] : memref<512x512xbf16, #tpu.memory_space<vmem>>, vector<512x512xbf16>
    %cst_8 = arith.constant dense<0.000000e+00> : vector<2x512xf32>
    %13 = tpu.matmul %11, %12, %cst_8 {dimension_numbers = #tpu.dot_dimension_numbers<[1], [0], [0], [1], [0, 0, 1, 1], [], []>} : vector<2x512xbf16>, vector<512x512xbf16>, vector<2x512xf32> -> vector<2x512xf32>
    %c0_9 = arith.constant 0 : index
    %c0_10 = arith.constant 0 : index
    %14 = vector.load %arg5[%c0_9, %c0_10] : memref<1x512xf32, #tpu.memory_space<vmem>>, vector<1x512xf32>
    %15 = vector.broadcast %14 : vector<1x512xf32> to vector<2x512xf32>
    %16 = arith.addf %13, %15 : vector<2x512xf32>
    %17 = vector.extract_strided_slice %16 {offsets = [0, 0], sizes = [2, 256], strides = [1, 1]} : vector<2x512xf32> to vector<2x256xf32>
    %18 = vector.extract_strided_slice %16 {offsets = [0, 256], sizes = [2, 256], strides = [1, 1]} : vector<2x512xf32> to vector<2x256xf32>
    %19 = arith.maximumf %17, %18 : vector<2x256xf32>
    %cst_11 = arith.constant 0.000000e+00 : f32
    %20 = vector.broadcast %cst_11 : f32 to vector<2x256xf32>
    %21 = arith.maximumf %19, %20 : vector<2x256xf32>
    %22 = arith.truncf %21 : vector<2x256xf32> to vector<2x256xbf16>
    %c0_12 = arith.constant 0 : index
    %c0_13 = arith.constant 0 : index
    %23 = vector.load %arg6[%c0_12, %c0_13] : memref<256x512xbf16, #tpu.memory_space<vmem>>, vector<256x512xbf16>
    %cst_14 = arith.constant dense<0.000000e+00> : vector<2x512xf32>
    %24 = tpu.matmul %22, %23, %cst_14 {dimension_numbers = #tpu.dot_dimension_numbers<[1], [0], [0], [1], [0, 0, 1, 1], [], []>} : vector<2x256xbf16>, vector<256x512xbf16>, vector<2x512xf32> -> vector<2x512xf32>
    %c0_15 = arith.constant 0 : index
    %c0_16 = arith.constant 0 : index
    %25 = vector.load %arg7[%c0_15, %c0_16] : memref<1x512xf32, #tpu.memory_space<vmem>>, vector<1x512xf32>
    %26 = vector.broadcast %25 : vector<1x512xf32> to vector<2x512xf32>
    %27 = arith.addf %24, %26 : vector<2x512xf32>
    %cst_17 = arith.constant 0.000000e+00 : f32
    %28 = vector.broadcast %cst_17 : f32 to vector<2x512xf32>
    %29 = arith.maximumf %27, %28 : vector<2x512xf32>
    %30 = arith.truncf %29 : vector<2x512xf32> to vector<2x512xbf16>
    %c0_18 = arith.constant 0 : index
    %c0_19 = arith.constant 0 : index
    %31 = vector.load %arg8[%c0_18, %c0_19] : memref<512x256xbf16, #tpu.memory_space<vmem>>, vector<512x256xbf16>
    %cst_20 = arith.constant dense<0.000000e+00> : vector<2x256xf32>
    %32 = tpu.matmul %30, %31, %cst_20 {dimension_numbers = #tpu.dot_dimension_numbers<[1], [0], [0], [1], [0, 0, 1, 1], [], []>} : vector<2x512xbf16>, vector<512x256xbf16>, vector<2x256xf32> -> vector<2x256xf32>
    %c0_21 = arith.constant 0 : index
    %c0_22 = arith.constant 0 : index
    %33 = vector.load %arg9[%c0_21, %c0_22] : memref<1x256xf32, #tpu.memory_space<vmem>>, vector<1x256xf32>
    %34 = vector.broadcast %33 : vector<1x256xf32> to vector<2x256xf32>
    %35 = arith.addf %32, %34 : vector<2x256xf32>
    %cst_23 = arith.constant 0.000000e+00 : f32
    %36 = vector.broadcast %cst_23 : f32 to vector<2x256xf32>
    %37 = arith.maximumf %35, %36 : vector<2x256xf32>
    %38 = arith.truncf %37 : vector<2x256xf32> to vector<2x256xbf16>
    %c0_24 = arith.constant 0 : index
    %c0_25 = arith.constant 0 : index
    %39 = vector.load %arg10[%c0_24, %c0_25] : memref<256x128xbf16, #tpu.memory_space<vmem>>, vector<256x128xbf16>
    %cst_26 = arith.constant dense<0.000000e+00> : vector<2x128xf32>
    %40 = tpu.matmul %38, %39, %cst_26 {dimension_numbers = #tpu.dot_dimension_numbers<[1], [0], [0], [1], [0, 0, 1, 1], [], []>} : vector<2x256xbf16>, vector<256x128xbf16>, vector<2x128xf32> -> vector<2x128xf32>
    %c0_27 = arith.constant 0 : index
    %c0_28 = arith.constant 0 : index
    %41 = vector.load %arg11[%c0_27, %c0_28] : memref<1x128xf32, #tpu.memory_space<vmem>>, vector<1x128xf32>
    %42 = vector.broadcast %41 : vector<1x128xf32> to vector<2x128xf32>
    %43 = arith.addf %40, %42 : vector<2x128xf32>
    %cst_29 = arith.constant 0.000000e+00 : f32
    %44 = vector.broadcast %cst_29 : f32 to vector<2x128xf32>
    %45 = arith.maximumf %43, %44 : vector<2x128xf32>
    %46 = arith.truncf %45 : vector<2x128xf32> to vector<2x128xbf16>
    %c0_30 = arith.constant 0 : index
    %c0_31 = arith.constant 0 : index
    %47 = vector.load %arg12[%c0_30, %c0_31] : memref<128x128xbf16, #tpu.memory_space<vmem>>, vector<128x128xbf16>
    %cst_32 = arith.constant dense<0.000000e+00> : vector<2x128xf32>
    %48 = tpu.matmul %46, %47, %cst_32 {dimension_numbers = #tpu.dot_dimension_numbers<[1], [0], [0], [1], [0, 0, 1, 1], [], []>} : vector<2x128xbf16>, vector<128x128xbf16>, vector<2x128xf32> -> vector<2x128xf32>
    %c0_33 = arith.constant 0 : index
    %c0_34 = arith.constant 0 : index
    %49 = vector.load %arg13[%c0_33, %c0_34] : memref<1x128xf32, #tpu.memory_space<vmem>>, vector<1x128xf32>
    %50 = vector.broadcast %49 : vector<1x128xf32> to vector<2x128xf32>
    %51 = arith.addf %48, %50 : vector<2x128xf32>
    %cst_35 = arith.constant dense<0xFF800000> : vector<2xf32>
    %52 = vector.multi_reduction <maximumf>, %51, %cst_35 [1] : vector<2x128xf32> to vector<2xf32>
    %53 = vector.shape_cast %52 : vector<2xf32> to vector<2x1xf32>
    %54 = vector.broadcast %53 : vector<2x1xf32> to vector<2x128xf32>
    %55 = arith.subf %51, %54 : vector<2x128xf32>
    %56 = math.exp %55 : vector<2x128xf32>
    %cst_36 = arith.constant dense<0.000000e+00> : vector<2xf32>
    %57 = vector.multi_reduction <add>, %56, %cst_36 [1] : vector<2x128xf32> to vector<2xf32>
    %58 = vector.shape_cast %57 : vector<2xf32> to vector<2x1xf32>
    %59 = math.log %58 : vector<2x1xf32>
    %60 = vector.broadcast %59 : vector<2x1xf32> to vector<2x128xf32>
    %61 = arith.subf %55, %60 : vector<2x128xf32>
    %c0_37 = arith.constant 0 : index
    %c0_38 = arith.constant 0 : index
    %62 = vector.load %arg14[%c0_37, %c0_38] : memref<2x128xf32, #tpu.memory_space<vmem>>, vector<2x128xf32>
    tpu.vector_store %arg14[%c0_37, %c0_38], %61 {strides = array<i32>} : memref<2x128xf32, #tpu.memory_space<vmem>>, vector<2x128xf32>,
    return
  }
  func.func @transform_0(%arg0: i32) -> (i32, i32) {
    %c0_i32 = arith.constant 0 : i32
    %c0_i32_0 = arith.constant 0 : i32
    return %arg0, %c0_i32 : i32, i32
  }
  func.func @transform_1(%arg0: i32) -> (i32, i32) {
    %c0_i32 = arith.constant 0 : i32
    %c0_i32_0 = arith.constant 0 : i32
    %c0_i32_1 = arith.constant 0 : i32
    return %c0_i32, %c0_i32_0 : i32, i32
  }
  func.func @transform_2(%arg0: i32) -> (i32, i32) {
    %c0_i32 = arith.constant 0 : i32
    %c0_i32_0 = arith.constant 0 : i32
    %c0_i32_1 = arith.constant 0 : i32
    return %c0_i32, %c0_i32_0 : i32, i32
  }
  func.func @transform_3(%arg0: i32) -> (i32, i32) {
    %c0_i32 = arith.constant 0 : i32
    %c0_i32_0 = arith.constant 0 : i32
    %c0_i32_1 = arith.constant 0 : i32
    return %c0_i32, %c0_i32_0 : i32, i32
  }
  func.func @transform_4(%arg0: i32) -> (i32, i32) {
    %c0_i32 = arith.constant 0 : i32
    %c0_i32_0 = arith.constant 0 : i32
    %c0_i32_1 = arith.constant 0 : i32
    return %c0_i32, %c0_i32_0 : i32, i32
  }
  func.func @transform_5(%arg0: i32) -> (i32, i32) {
    %c0_i32 = arith.constant 0 : i32
    %c0_i32_0 = arith.constant 0 : i32
    %c0_i32_1 = arith.constant 0 : i32
    return %c0_i32, %c0_i32_0 : i32, i32
  }
  func.func @transform_6(%arg0: i32) -> (i32, i32) {
    %c0_i32 = arith.constant 0 : i32
    %c0_i32_0 = arith.constant 0 : i32
    %c0_i32_1 = arith.constant 0 : i32
    return %c0_i32, %c0_i32_0 : i32, i32
  }
  func.func @transform_7(%arg0: i32) -> (i32, i32) {
    %c0_i32 = arith.constant 0 : i32
    %c0_i32_0 = arith.constant 0 : i32
    %c0_i32_1 = arith.constant 0 : i32
    return %c0_i32, %c0_i32_0 : i32, i32
  }
  func.func @transform_8(%arg0: i32) -> (i32, i32) {
    %c0_i32 = arith.constant 0 : i32
    %c0_i32_0 = arith.constant 0 : i32
    %c0_i32_1 = arith.constant 0 : i32
    return %c0_i32, %c0_i32_0 : i32, i32
  }
  func.func @transform_9(%arg0: i32) -> (i32, i32) {
    %c0_i32 = arith.constant 0 : i32
    %c0_i32_0 = arith.constant 0 : i32
    %c0_i32_1 = arith.constant 0 : i32
    return %c0_i32, %c0_i32_0 : i32, i32
  }
  func.func @transform_10(%arg0: i32) -> (i32, i32) {
    %c0_i32 = arith.constant 0 : i32
    %c0_i32_0 = arith.constant 0 : i32
    %c0_i32_1 = arith.constant 0 : i32
    return %c0_i32, %c0_i32_0 : i32, i32
  }
  func.func @transform_11(%arg0: i32) -> (i32, i32) {
    %c0_i32 = arith.constant 0 : i32
    %c0_i32_0 = arith.constant 0 : i32
    %c0_i32_1 = arith.constant 0 : i32
    return %c0_i32, %c0_i32_0 : i32, i32
  }
  func.func @transform_12(%arg0: i32) -> (i32, i32) {
    %c0_i32 = arith.constant 0 : i32
    %c0_i32_0 = arith.constant 0 : i32
    %c0_i32_1 = arith.constant 0 : i32
    return %c0_i32, %c0_i32_0 : i32, i32
  }
  func.func @transform_13(%arg0: i32) -> (i32, i32) {
    %c0_i32 = arith.constant 0 : i32
    %c0_i32_0 = arith.constant 0 : i32
    return %arg0, %c0_i32 : i32, i32
  }
}

</mosaic_0001>

<bundles_post_ra>
// kernel: fl_model_forward.1
= control target key start
LH: loop header
LB: loop body
LE: loop exit
PB: predicated region body
PF: predicated region fallthrough
CT: control target
= control target key end

     0   :  { %18 = vsyncpa [#allocation3], 0  ;;  %s4359_s0 = inlined_call_operand.hbm [shape: bf16[2,64], index: 0, kind: input, shape index: {}]   ;;  %s4360_s1 = inlined_call_operand.hbm [shape: bf16[64,1024], index: 1, kind: input, shape index: {}]   ;;  %s4361_s2 = inlined_call_operand.hbm [shape: f32[1,1024], index: 2, kind: input, shape index: {}]   ;;  %s4362_s3 = inlined_call_operand.hbm [shape: bf16[512,512], index: 3, kind: input, shape index: {}]   ;;  %s4363_s4 = inlined_call_operand.hbm [shape: f32[1,512], index: 4, kind: input, shape index: {}]   ;;  %s4364_s5 = inlined_call_operand.hbm [shape: bf16[256,512], index: 5, kind: input, shape index: {}]   ;;  %s4365_s6 = inlined_call_operand.hbm [shape: f32[1,512], index: 6, kind: input, shape index: {}]   ;;  %s4366_s7 = inlined_call_operand.hbm [shape: bf16[512,256], index: 7, kind: input, shape index: {}]   ;;  %s4367_s8 = inlined_call_operand.hbm [shape: f32[1,256], index: 8, kind: input, shape index: {}]   ;;  %s4368_s9 = inlined_call_operand.hbm [shape: bf16[256,128], index: 9, kind: input, shape index: {}]   ;;  %s4369_s10 = inlined_call_operand.hbm [shape: f32[1,128], index: 10, kind: input, shape index: {}]   ;;  %s4370_s11 = inlined_call_operand.hbm [shape: bf16[128,128], index: 11, kind: input, shape index: {}]   ;;  %s4371_s12 = inlined_call_operand.hbm [shape: f32[1,128], index: 12, kind: input, shape index: {}]   ;;  %s4372_s13 = inlined_call_operand.hbm [shape: f32[2,128], index: 13, kind: output, shape index: {}]  }
   0x1   :  { %19 = vsyncpa [#allocation6], 0 }
   0x2   :  { %20 = vsyncpa [#allocation9], 0 }
   0x3   :  { %21 = vsyncpa [#allocation12], 0 }
   0x4   :  { %22 = vsyncpa [#allocation15], 0 }
   0x5   :  { %23 = vsyncpa [#allocation18], 0 }
   0x6   :  { %24 = vsyncpa [#allocation21], 0 }
   0x7   :  { %25 = vsyncpa [#allocation4], 0  ;;  %s4032_s25 = smov [#allocation5]   ;;  %s3708_s29 = scalar_lea.hbm %s4360_s1, 4096 }
   0x8   :  { %s41_s26 = sshll.u32 %s4032_s25, 4  ;;  %p3709_p0 = scmp.ne.s32.totalorder %s4360_s1, %s3708_s29  ;;  %s42_s26 = int_to_ptr.vmem [resolvable:$true] %s41_s26 }
   0x9   :  { %p3712_p1 = scmp.lt.u32.totalorder %s3708_s29, %s4360_s1 }
   0xb   :  { %p3714_p2 = pnand %p3712_p1, %p3709_p0 }
   0xd   :  { %3717 = shalt.err (!%p3714_p2)
}
   0xe   :  { %s3718_s17 = scalar_lea.vmem %s42_s26, 4096  ;;  %p3723_p4 = scmp.lt.s32.totalorder %s42_s26, %s42_s26 }
   0xf   :  { %p3719_p3 = scmp.ne.s32.totalorder %s42_s26, %s3718_s17  ;;  %p3724_p5 = scmp.lt.s32.totalorder %s3718_s17, %s3718_s17 }
  0x11   :  { %p3725_p6 = por %p3724_p5, %p3723_p4 }
  0x13   :  { %p3726_p7 = pnand %p3725_p6, %p3719_p3 }
  0x15   :  { %3729 = shalt.err (!%p3726_p7)
}
  0x16   :  { %s4033_s18 = smov 512   ;;  %s4034_s19 = smov 32  }
  0x17   :  { %47 = dma.hbm_to_vmem [thread:$0]  %s4360_s1, 4096, %s42_s26, [#allocation6], %s4033_s18, %s4033_s18, %s4034_s19  }
  0x18   :  { %s4035_s22 = smov [#allocation8]   ;;  %s3730_s27 = scalar_lea.hbm %s4362_s3, 16384 }
  0x19   :  { %s63_s23 = sshll.u32 %s4035_s22, 4  ;;  %p3731_p8 = scmp.ne.s32.totalorder %s4362_s3, %s3730_s27  ;;  %s64_s23 = int_to_ptr.vmem [resolvable:$true] %s63_s23 }
  0x1a   :  { %p3734_p9 = scmp.lt.u32.totalorder %s3730_s27, %s4362_s3 }
  0x1c   :  { %p3736_p10 = pnand %p3734_p9, %p3731_p8 }
  0x1e   :  { %3739 = shalt.err (!%p3736_p10)
}
  0x1f   :  { %s3740_s15 = scalar_lea.vmem %s64_s23, 16384  ;;  %p3745_p12 = scmp.lt.s32.totalorder %s64_s23, %s64_s23 }
  0x20   :  { %p3741_p11 = scmp.ne.s32.totalorder %s64_s23, %s3740_s15  ;;  %p3746_p13 = scmp.lt.s32.totalorder %s3740_s15, %s3740_s15 }
  0x22   :  { %p3747_p0 = por %p3746_p13, %p3745_p12 }
  0x24   :  { %p3748_p1 = pnand %p3747_p0, %p3741_p11 }
  0x26   :  { %3751 = shalt.err (!%p3748_p1)
}
  0x27   :  { %s4036_s1 = smov 256   ;;  %s4037_s26 = smov 16  }
  0x28   :  { %69 = dma.hbm_to_vmem [thread:$0]  %s4362_s3, 16384, %s64_s23, [#allocation9], %s4036_s1, %s4036_s1, %s4037_s26  }
  0x29   :  { %s4038_s18 = smov [#allocation11]   ;;  %s4039_s20 = smov [#allocation14]  }
  0x2a   :  { %s85_s19 = sshll.u32 %s4038_s18, 4  ;;  %s107_s21 = sshll.u32 %s4039_s20, 4  ;;  %s86_s19 = int_to_ptr.vmem [resolvable:$true] %s85_s19  ;;  %s4151_s21 = int_to_ptr.vmem [resolvable:$true] %s107_s21 }
  0x2b   :  { %s3752_s25 = scalar_lea.hbm %s4364_s5, 8192 }
  0x2c   :  { %p3753_p2 = scmp.ne.s32.totalorder %s4364_s5, %s3752_s25  ;;  %p3756_p3 = scmp.lt.u32.totalorder %s3752_s25, %s4364_s5 }
  0x2e   :  { %p3758_p4 = pnand %p3756_p3, %p3753_p2 }
  0x30   :  { %3761 = shalt.err (!%p3758_p4)
}
  0x31   :  { %s3762_s3 = scalar_lea.vmem %s86_s19, 8192  ;;  %p3767_p6 = scmp.lt.s32.totalorder %s86_s19, %s86_s19 }
  0x32   :  { %p3763_p5 = scmp.ne.s32.totalorder %s86_s19, %s3762_s3  ;;  %p3768_p7 = scmp.lt.s32.totalorder %s3762_s3, %s3762_s3 }
  0x34   :  { %p3769_p8 = por %p3768_p7, %p3767_p6 }
  0x36   :  { %p3770_p9 = pnand %p3769_p8, %p3763_p5 }
  0x38   :  { %3773 = shalt.err (!%p3770_p9)
}
  0x39   :  { %91 = dma.hbm_to_vmem [thread:$0]  %s4364_s5, 8192, %s86_s19, [#allocation12], %s4036_s1, %s4036_s1, %s4037_s26  }
  0x3a   :  { %s3774_s17 = scalar_lea.hbm %s4366_s7, 8192 }
  0x3b   :  { %p3775_p10 = scmp.ne.s32.totalorder %s4366_s7, %s3774_s17  ;;  %p3778_p11 = scmp.lt.u32.totalorder %s3774_s17, %s4366_s7 }
  0x3d   :  { %p3780_p12 = pnand %p3778_p11, %p3775_p10 }
  0x3f   :  { %3783 = shalt.err (!%p3780_p12)
}
  0x40   :  { %s3784_s25 = scalar_lea.vmem %s4151_s21, 8192  ;;  %p3789_p0 = scmp.lt.s32.totalorder %s4151_s21, %s4151_s21 }
  0x41   :  { %p3785_p13 = scmp.ne.s32.totalorder %s4151_s21, %s3784_s25  ;;  %p3790_p1 = scmp.lt.s32.totalorder %s3784_s25, %s3784_s25 }
  0x43   :  { %p3791_p2 = por %p3790_p1, %p3789_p0 }
  0x45   :  { %p3792_p3 = pnand %p3791_p2, %p3785_p13 }
  0x47   :  { %3795 = shalt.err (!%p3792_p3)
}
  0x48   :  { %s4040_s5 = smov 128   ;;  %s4041_s1 = smov 8  }
  0x49   :  { %113 = dma.hbm_to_vmem [thread:$0]  %s4366_s7, 8192, %s4151_s21, [#allocation15], %s4040_s5, %s4040_s5, %s4041_s1  }
  0x4a   :  { %s4042_s27 = smov [#allocation17]   ;;  %s3796_s3 = scalar_lea.hbm %s4368_s9, 2048 }
  0x4b   :  { %s129_s28 = sshll.u32 %s4042_s27, 4  ;;  %p3797_p4 = scmp.ne.s32.totalorder %s4368_s9, %s3796_s3  ;;  %s130_s28 = int_to_ptr.vmem [resolvable:$true] %s129_s28 }
  0x4c   :  { %p3800_p5 = scmp.lt.u32.totalorder %s3796_s3, %s4368_s9 }
  0x4e   :  { %p3802_p6 = pnand %p3800_p5, %p3797_p4 }
  0x50   :  { %3805 = shalt.err (!%p3802_p6)
}
  0x51   :  { %s3806_s17 = scalar_lea.vmem %s130_s28, 2048  ;;  %p3811_p8 = scmp.lt.s32.totalorder %s130_s28, %s130_s28 }
  0x52   :  { %p3807_p7 = scmp.ne.s32.totalorder %s130_s28, %s3806_s17  ;;  %p3812_p9 = scmp.lt.s32.totalorder %s3806_s17, %s3806_s17 }
  0x54   :  { %p3813_p10 = por %p3812_p9, %p3811_p8 }
  0x56   :  { %p3814_p11 = pnand %p3813_p10, %p3807_p7 }
  0x58   :  { %3817 = shalt.err (!%p3814_p11)
}
  0x59   :  { %s4043_s7 = smov 64   ;;  %s4044_s21 = smov 4  }
  0x5a   :  { %135 = dma.hbm_to_vmem [thread:$0]  %s4368_s9, 2048, %s130_s28, [#allocation18], %s4043_s7, %s4043_s7, %s4044_s21  }
  0x5b   :  { %s4045_s22 = smov [#allocation20]   ;;  %s4046_s25 = smov [#allocation2]  }
  0x5c   :  { %s151_s24 = sshll.u32 %s4045_s22, 4  ;;  %s32_s5 = sshll.u32 %s4046_s25, 4  ;;  %s152_s24 = int_to_ptr.vmem [resolvable:$true] %s151_s24  ;;  %s33_s5 = int_to_ptr.vmem [resolvable:$true] %s32_s5 }
  0x5d   :  { %s3818_s19 = scalar_lea.hbm %s4370_s11, 1024 }
  0x5e   :  { %p3819_p12 = scmp.ne.s32.totalorder %s4370_s11, %s3818_s19  ;;  %p3822_p13 = scmp.lt.u32.totalorder %s3818_s19, %s4370_s11 }
  0x60   :  { %p3824_p0 = pnand %p3822_p13, %p3819_p12 }
  0x62   :  { %3827 = shalt.err (!%p3824_p0)
}
  0x63   :  { %s3828_s9 = scalar_lea.vmem %s152_s24, 1024  ;;  %p3833_p2 = scmp.lt.s32.totalorder %s152_s24, %s152_s24 }
  0x64   :  { %p3829_p1 = scmp.ne.s32.totalorder %s152_s24, %s3828_s9  ;;  %p3834_p3 = scmp.lt.s32.totalorder %s3828_s9, %s3828_s9 }
  0x66   :  { %p3835_p4 = por %p3834_p3, %p3833_p2 }
  0x68   :  { %p3836_p5 = pnand %p3835_p4, %p3829_p1 }
  0x6a   :  { %3839 = shalt.err (!%p3836_p5)
}
  0x6b   :  { %157 = dma.hbm_to_vmem [thread:$0]  %s4370_s11, 1024, %s152_s24, [#allocation21], %s4043_s7, %s4043_s7, %s4044_s21  }
  0x6c   :  { %s3840_s16 = scalar_lea.hbm %s4359_s0, 16 }
  0x6d   :  { %p3841_p6 = scmp.ne.s32.totalorder %s4359_s0, %s3840_s16  ;;  %p3844_p7 = scmp.lt.u32.totalorder %s3840_s16, %s4359_s0 }
  0x6f   :  { %p3846_p8 = pnand %p3844_p7, %p3841_p6 }
  0x71   :  { %3849 = shalt.err (!%p3846_p8)
}
  0x72   :  { %s3850_s25 = scalar_lea.vmem %s33_s5, 16  ;;  %s3854_s1 = scalar_lea.vmem %s33_s5, 32 }
  0x73   :  { %p3851_p9 = scmp.ne.s32.totalorder %s33_s5, %s3850_s25  ;;  %p3855_p10 = scmp.lt.s32.totalorder %s33_s5, %s33_s5 }
  0x74   :  { %p3856_p11 = scmp.lt.s32.totalorder %s3854_s1, %s3850_s25 }
  0x76   :  { %p3857_p12 = por %p3856_p11, %p3855_p10 }
  0x78   :  { %p3858_p13 = pnand %p3857_p12, %p3851_p9 }
  0x7a   :  { %3861 = shalt.err (!%p3858_p13)
}
  0x7b   :  { %35 = dma.hbm_to_vmem [thread:$0]  %s4359_s0, 16, %s33_s5, [#allocation3]  }
  0x7c   :  { %s4047_s21 = smov [#allocation7]   ;;  %s4048_s26 = smov [#allocation10]  }
  0x7d   :  { %s54_s24 = sshll.u32 %s4047_s21, 4  ;;  %s76_s19 = sshll.u32 %s4048_s26, 4  ;;  %s55_s24 = int_to_ptr.vmem [resolvable:$true] %s54_s24  ;;  %s77_s19 = int_to_ptr.vmem [resolvable:$true] %s76_s19 }
  0x7e   :  { %s3862_s30 = scalar_lea.hbm %s4361_s2, 128 }
  0x7f   :  { %p3863_p0 = scmp.ne.s32.totalorder %s4361_s2, %s3862_s30  ;;  %p3866_p1 = scmp.lt.u32.totalorder %s3862_s30, %s4361_s2 }
  0x81   :  { %p3868_p2 = pnand %p3866_p1, %p3863_p0 }
  0x83   :  { %3871 = shalt.err (!%p3868_p2)
}
  0x84   :  { %s3872_s0 = scalar_lea.vmem %s55_s24, 128  ;;  %p3877_p4 = scmp.lt.s32.totalorder %s55_s24, %s55_s24 }
  0x85   :  { %p3873_p3 = scmp.ne.s32.totalorder %s55_s24, %s3872_s0  ;;  %p3878_p5 = scmp.lt.s32.totalorder %s3872_s0, %s3872_s0 }
  0x87   :  { %p3879_p6 = por %p3878_p5, %p3877_p4 }
  0x89   :  { %p3880_p7 = pnand %p3879_p6, %p3873_p3 }
  0x8b   :  { %3883 = shalt.err (!%p3880_p7)
}
  0x8c   :  { %57 = dma.hbm_to_vmem [thread:$0]  %s4361_s2, 128, %s55_s24, [#allocation6]  }
  0x8d   :  { %s3884_s17 = scalar_lea.hbm %s4363_s4, 64 }
  0x8e   :  { %p3885_p8 = scmp.ne.s32.totalorder %s4363_s4, %s3884_s17  ;;  %p3888_p9 = scmp.lt.u32.totalorder %s3884_s17, %s4363_s4 }
  0x90   :  { %p3890_p10 = pnand %p3888_p9, %p3885_p8 }
  0x92   :  { %3893 = shalt.err (!%p3890_p10)
}
  0x93   :  { %s3894_s1 = scalar_lea.vmem %s77_s19, 64  ;;  %p3899_p12 = scmp.lt.s32.totalorder %s77_s19, %s77_s19 }
  0x94   :  { %p3895_p11 = scmp.ne.s32.totalorder %s77_s19, %s3894_s1  ;;  %p3900_p13 = scmp.lt.s32.totalorder %s3894_s1, %s3894_s1 }
  0x96   :  { %p3901_p0 = por %p3900_p13, %p3899_p12 }
  0x98   :  { %p3902_p1 = pnand %p3901_p0, %p3895_p11 }
  0x9a   :  { %3905 = shalt.err (!%p3902_p1)
}
  0x9b   :  { %79 = dma.hbm_to_vmem [thread:$0]  %s4363_s4, 64, %s77_s19, [#allocation9]  }
  0x9c   :  { %s4049_s7 = smov [#allocation13]   ;;  %s4050_s24 = smov [#allocation16]  }
  0x9d   :  { %s98_s21 = sshll.u32 %s4049_s7, 4  ;;  %s120_s26 = sshll.u32 %s4050_s24, 4  ;;  %s99_s21 = int_to_ptr.vmem [resolvable:$true] %s98_s21  ;;  %s121_s26 = int_to_ptr.vmem [resolvable:$true] %s120_s26 }
  0x9e   :  { %s3906_s30 = scalar_lea.hbm %s4365_s6, 64 }
  0x9f   :  { %p3907_p2 = scmp.ne.s32.totalorder %s4365_s6, %s3906_s30  ;;  %p3910_p3 = scmp.lt.u32.totalorder %s3906_s30, %s4365_s6 }
  0xa1   :  { %p3912_p4 = pnand %p3910_p3, %p3907_p2 }
  0xa3   :  { %3915 = shalt.err (!%p3912_p4)
}
  0xa4   :  { %s3916_s4 = scalar_lea.vmem %s99_s21, 64  ;;  %p3921_p6 = scmp.lt.s32.totalorder %s99_s21, %s99_s21 }
  0xa5   :  { %p3917_p5 = scmp.ne.s32.totalorder %s99_s21, %s3916_s4  ;;  %p3922_p7 = scmp.lt.s32.totalorder %s3916_s4, %s3916_s4 }
  0xa7   :  { %p3923_p8 = por %p3922_p7, %p3921_p6 }
  0xa9   :  { %p3924_p9 = pnand %p3923_p8, %p3917_p5 }
  0xab   :  { %3927 = shalt.err (!%p3924_p9)
}
  0xac   :  { %101 = dma.hbm_to_vmem [thread:$0]  %s4365_s6, 64, %s99_s21, [#allocation12]  }
  0xad   :  { %s3928_s15 = scalar_lea.hbm %s4367_s8, 32 }
  0xae   :  { %p3929_p10 = scmp.ne.s32.totalorder %s4367_s8, %s3928_s15  ;;  %p3932_p11 = scmp.lt.u32.totalorder %s3928_s15, %s4367_s8 }
  0xb0   :  { %p3934_p12 = pnand %p3932_p11, %p3929_p10 }
  0xb2   :  { %3937 = shalt.err (!%p3934_p12)
}
  0xb3   :  { %s3938_s22 = scalar_lea.vmem %s121_s26, 32  ;;  %p3943_p0 = scmp.lt.s32.totalorder %s121_s26, %s121_s26 }
  0xb4   :  { %p3939_p13 = scmp.ne.s32.totalorder %s121_s26, %s3938_s22  ;;  %p3944_p1 = scmp.lt.s32.totalorder %s3938_s22, %s3938_s22 }
  0xb6   :  { %p3945_p2 = por %p3944_p1, %p3943_p0 }
  0xb8   :  { %p3946_p3 = pnand %p3945_p2, %p3939_p13 }
  0xba   :  { %3949 = shalt.err (!%p3946_p3)
}
  0xbb   :  { %123 = dma.hbm_to_vmem [thread:$0]  %s4367_s8, 32, %s121_s26, [#allocation15]  }
  0xbc   :  { %s4051_s1 = smov [#allocation19]   ;;  %s4052_s11 = smov [#allocation22]  }
  0xbd   :  { %s142_s2 = sshll.u32 %s4051_s1, 4  ;;  %s164_s7 = sshll.u32 %s4052_s11, 4  ;;  %s143_s2 = int_to_ptr.vmem [resolvable:$true] %s142_s2  ;;  %s165_s7 = int_to_ptr.vmem [resolvable:$true] %s164_s7 }
  0xbe   :  { %s3950_s27 = scalar_lea.hbm %s4369_s10, 16 }
  0xbf   :  { %p3951_p4 = scmp.ne.s32.totalorder %s4369_s10, %s3950_s27  ;;  %p3954_p5 = scmp.lt.u32.totalorder %s3950_s27, %s4369_s10 }
  0xc1   :  { %p3956_p6 = pnand %p3954_p5, %p3951_p4 }
  0xc3   :  { %3959 = shalt.err (!%p3956_p6)
}
  0xc4   :  { %s3960_s8 = scalar_lea.vmem %s143_s2, 16  ;;  %s3964_s26 = scalar_lea.vmem %s143_s2, 32 }
  0xc5   :  { %p3961_p7 = scmp.ne.s32.totalorder %s143_s2, %s3960_s8  ;;  %p3965_p8 = scmp.lt.s32.totalorder %s143_s2, %s143_s2 }
  0xc6   :  { %p3966_p9 = scmp.lt.s32.totalorder %s3964_s26, %s3960_s8 }
  0xc8   :  { %p3967_p10 = por %p3966_p9, %p3965_p8 }
  0xca   :  { %p3968_p11 = pnand %p3967_p10, %p3961_p7 }
  0xcc   :  { %3971 = shalt.err (!%p3968_p11)
}
  0xcd   :  { %145 = dma.hbm_to_vmem [thread:$0]  %s4369_s10, 16, %s143_s2, [#allocation18]  }
  0xce   :  { %s3972_s0 = scalar_lea.hbm %s4371_s12, 16 }
  0xcf   :  { %p3973_p12 = scmp.ne.s32.totalorder %s4371_s12, %s3972_s0  ;;  %p3976_p13 = scmp.lt.u32.totalorder %s3972_s0, %s4371_s12 }
  0xd1   :  { %p3978_p0 = pnand %p3976_p13, %p3973_p12 }
  0xd3   :  { %3981 = shalt.err (!%p3978_p0)
}
  0xd4   :  { %s3982_s17 = scalar_lea.vmem %s165_s7, 16  ;;  %s3986_s18 = scalar_lea.vmem %s165_s7, 32 }
  0xd5   :  { %p3983_p1 = scmp.ne.s32.totalorder %s165_s7, %s3982_s17  ;;  %p3987_p2 = scmp.lt.s32.totalorder %s165_s7, %s165_s7 }
  0xd6   :  { %p3988_p3 = scmp.lt.s32.totalorder %s3986_s18, %s3982_s17 }
  0xd8   :  { %p3989_p4 = por %p3988_p3, %p3987_p2 }
  0xda   :  { %p3990_p5 = pnand %p3989_p4, %p3983_p1 }
  0xdc   :  { %3993 = shalt.err (!%p3990_p5)
}
  0xdd   :  { %167 = dma.hbm_to_vmem [thread:$0]  %s4371_s12, 16, %s165_s7, [#allocation21]  }
  0xde   :  { %4016 = dma.done.wait [#allocation3], 16  }
  0xdf   :  { %4017 = vsyncadd [#allocation3], 4294967280 }
  0xe0   :  { %4018 = dma.done.wait [#allocation6], 4224  }
  0xe1   :  { %4019 = vsyncadd [#allocation6], 4294963072 }
  0xe2   :  { %4020 = dma.done.wait [#allocation9], 16448  }
  0xe3   :  { %4021 = vsyncadd [#allocation9], 4294950848 }
  0xe4   :  { %4022 = dma.done.wait [#allocation12], 8256  }
  0xe5   :  { %4023 = vsyncadd [#allocation12], 4294959040 }
  0xe6   :  { %4024 = dma.done.wait [#allocation15], 8224  }
  0xe7   :  { %4025 = vsyncadd [#allocation15], 4294959072 }
  0xe8   :  { %4026 = dma.done.wait [#allocation18], 2064  }
  0xe9   :  { %4027 = vsyncadd [#allocation18], 4294965232 }
  0xea   :  { %4028 = dma.done.wait [#allocation21], 1040  }
  0xeb   :  { %4029 = vsyncadd [#allocation21], 4294966256  ;;  %v4053_v0 = vmov 0   ;;  %v209_v1 = vld [vmem:[#allocation5] sm:$0xff]  ;;  %v210_v16 = vld [vmem:[#allocation5 + $0x8] sm:$0xff]  ;;  %vm443_vm0 = vcmask 523264  }
  0xec   :  { %479 = vmatprep.mubr.bf16.mxu1 %v4053_v0  ;;  %v213_v2 = vld [vmem:[#allocation5 + $0x20] sm:$0xff]  ;;  %v214_v17 = vld [vmem:[#allocation5 + $0x28] sm:$0xff]  ;;  %v4291_v25 = vld [vmem:[#allocation2] sm:$0x1]  ;;  %vm4055_vm1 = vmmov 0   ;;  %vm2849_vm2 = vcmask 1041408  }
  0xed   :  { %v217_v3 = vld [vmem:[#allocation5 + $0x40] sm:$0xff]  ;;  %v2885_v4 = vcombine.high %v209_v1, %v213_v2  ;;  %v2884_v5 = vcombine.low %v209_v1, %v213_v2  ;;  %v3296_v18 = vld [vmem:[#allocation8 + $0x4] ss:$16 sps:$4 sm:$0xff]   ;;  %v2887_v21 = vcombine.high %v210_v16, %v214_v17  ;;  %v3301_v23 = vld [vmem:[#allocation8] ss:$16 sps:$4 sm:$0xff]   ;;  %v2886_v26 = vcombine.low %v210_v16, %v214_v17  ;;  %s4056_s12 = smov [#allocation23]  }
  0xee   :  { %v221_v6 = vld [vmem:[#allocation5 + $0x60] sm:$0xff]  ;;  %v218_v20 = vld [vmem:[#allocation5 + $0x48] sm:$0xff]  ;;  %1413 = vmatprep.subr.bf16.mxu0 %v3296_v18  ;;  %v211_v42 = vld [vmem:[#allocation5 + $0x10] sm:$0xff]  ;;  %s2869_s22 = sshll.u32 %s4056_s12, 4  ;;  %s2870_s22 = int_to_ptr.vmem [resolvable:$true] %s2869_s22 }
  0xef   :  { %v2893_v7 = vcombine.high %v217_v3, %v221_v6  ;;  %v225_v8 = vld [vmem:[#allocation5 + $0x80] sm:$0xff]  ;;  %447 = vmatprep.subr.bf16.mxu1 %v2885_v4  ;;  %v2892_v10 = vcombine.low %v217_v3, %v221_v6  ;;  %v222_v22 = vld [vmem:[#allocation5 + $0x68] sm:$0xff]  ;;  %1414 = vmatpush1.bf16.msra.mxu0 %v3301_v23  ;;  %v215_v43 = vld [vmem:[#allocation5 + $0x30] sm:$0xff]  ;;  %s3994_s6 = scalar_lea.vmem %s2870_s22, 32  ;;  %p3999_p7 = scmp.lt.s32.totalorder %s2870_s22, %s2870_s22 }
  0xf0   :  { %v229_v9 = vld [vmem:[#allocation5 + $0xa0] sm:$0xff]  ;;  %448 = vmatpush1.bf16.msra.mxu1 %v2884_v5  ;;  %v3302_v24 = vld [vmem:[#allocation8 + $0x24] ss:$16 sps:$4 sm:$0xff]   ;;  %v3307_v27 = vld [vmem:[#allocation8 + $0x20] ss:$16 sps:$4 sm:$0xff]   ;;  %v2895_v28 = vcombine.high %v218_v20, %v222_v22  ;;  %v2894_v33 = vcombine.low %v218_v20, %v222_v22  ;;  %v2889_v49 = vcombine.high %v211_v42, %v215_v43  ;;  %v2888_v51 = vcombine.low %v211_v42, %v215_v43  ;;  %p3995_p6 = scmp.ne.s32.totalorder %s2870_s22, %s3994_s6  ;;  %p4000_p8 = scmp.lt.s32.totalorder %s3994_s6, %s3994_s6 }
  0xf1   :  { %449 = vmatprep.subr.bf16.mxu1 %v2893_v7  ;;  %v2901_v11 = vcombine.high %v225_v8, %v229_v9  ;;  %v233_v12 = vld [vmem:[#allocation5 + $0xc0] sm:$0xff]  ;;  %v2900_v14 = vcombine.low %v225_v8, %v229_v9  ;;  %1415 = vmatprep.subr.bf16.mxu0 %v3302_v24  ;;  %v3308_v29 = vld [vmem:[#allocation8 + $0x44] ss:$16 sps:$4 sm:$0xff]   ;;  %v3313_v32 = vld [vmem:[#allocation8 + $0x40] ss:$16 sps:$4 sm:$0xff]  }
  0xf2   :  { %v237_v13 = vld [vmem:[#allocation5 + $0xe0] sm:$0xff]  ;;  %v226_v30 = vld [vmem:[#allocation5 + $0x88] sm:$0xff]  ;;  %v219_v47 = vld [vmem:[#allocation5 + $0x50] sm:$0xff]  ;;  %p4001_p9 = por %p4000_p8, %p3999_p7 }
  0xf3   :  { %v2909_v15 = vcombine.high %v233_v12, %v237_v13  ;;  %v2908_v19 = vcombine.low %v233_v12, %v237_v13  ;;  %v230_v31 = vld [vmem:[#allocation5 + $0xa8] sm:$0xff]  ;;  %1416 = vmatpush1.bf16.msra.mxu0 %v3307_v27  ;;  %v223_v48 = vld [vmem:[#allocation5 + $0x70] sm:$0xff]  ;;  %v212_v60 = vld [vmem:[#allocation5 + $0x18] sm:$0xff] }
  0xf4   :  { %450 = vmatpush1.bf16.msra.mxu1 %v2892_v10  ;;  %v3314_v34 = vld [vmem:[#allocation8 + $0x64] ss:$16 sps:$4 sm:$0xff]   ;;  %v2903_v35 = vcombine.high %v226_v30, %v230_v31  ;;  %1417 = vmatprep.subr.bf16.mxu0 %v3308_v29  ;;  %v3319_v38 = vld [vmem:[#allocation8 + $0x60] ss:$16 sps:$4 sm:$0xff]   ;;  %v2902_v39 = vcombine.low %v226_v30, %v230_v31  ;;  %v227_v52 = vld [vmem:[#allocation5 + $0x90] sm:$0xff]  ;;  %v2897_v54 = vcombine.high %v219_v47, %v223_v48  ;;  %p4002_p10 = pnand %p4001_p9, %p3995_p6 }
  0xf5   :  { %451 = vmatprep.subr.bf16.mxu1 %v2901_v11  ;;  %v234_v36 = vld [vmem:[#allocation5 + $0xc8] sm:$0xff]  ;;  %v231_v53 = vld [vmem:[#allocation5 + $0xb0] sm:$0xff]  ;;  %v2896_v55 = vcombine.low %v219_v47, %v223_v48  ;;  %v216_v61 = vld [vmem:[#allocation5 + $0x38] sm:$0xff] }
  0xf6   :  { %v238_v37 = vld [vmem:[#allocation5 + $0xe8] sm:$0xff]  ;;  %v235_v56 = vld [vmem:[#allocation5 + $0xd0] sm:$0xff]  ;;  %v2905_v58 = vcombine.high %v227_v52, %v231_v53  ;;  %v2904_v59 = vcombine.low %v227_v52, %v231_v53  ;;  %v220_v1 = vld [vmem:[#allocation5 + $0x58] sm:$0xff]  ;;  %v2891_v3 = vcombine.high %v212_v60, %v216_v61  ;;  %v2890_v4 = vcombine.low %v212_v60, %v216_v61 }
  0xf7   :  { %1418 = vmatpush1.bf16.msra.mxu0 %v3313_v32  ;;  %v3320_v40 = vld [vmem:[#allocation8 + $0x84] ss:$16 sps:$4 sm:$0xff]   ;;  %v2911_v41 = vcombine.high %v234_v36, %v238_v37  ;;  %v3325_v44 = vld [vmem:[#allocation8 + $0x80] ss:$16 sps:$4 sm:$0xff]   ;;  %v2910_v46 = vcombine.low %v234_v36, %v238_v37  ;;  %v239_v57 = vld [vmem:[#allocation5 + $0xf0] sm:$0xff] }
  0xf8   :  { %452 = vmatpush1.bf16.msra.mxu1 %v2900_v14  ;;  %1419 = vmatprep.subr.bf16.mxu0 %v3314_v34  ;;  %v3326_v45 = vld [vmem:[#allocation8 + $0xa4] ss:$16 sps:$4 sm:$0xff]   ;;  %v3331_v50 = vld [vmem:[#allocation8 + $0xa0] ss:$16 sps:$4 sm:$0xff]   ;;  %v2913_v62 = vcombine.high %v235_v56, %v239_v57  ;;  %v2912_v63 = vcombine.low %v235_v56, %v239_v57  ;;  %v3300_v14 = vld [vmem:[#allocation8 + $0xc] ss:$16 sps:$4 sm:$0xff]  }
  0xf9   :  { %453 = vmatprep.subr.bf16.mxu1 %v2909_v15  ;;  %v224_v2 = vld [vmem:[#allocation5 + $0x78] sm:$0xff]  ;;  %v3298_v16 = vld [vmem:[#allocation8 + $0x8] ss:$16 sps:$4 sm:$0xff]   ;;  %v3306_v17 = vld [vmem:[#allocation8 + $0x2c] ss:$16 sps:$4 sm:$0xff]  }
  0xfa   :  { %v228_v5 = vld [vmem:[#allocation5 + $0x98] sm:$0xff]  ;;  %v2899_v7 = vcombine.high %v220_v1, %v224_v2  ;;  %v2898_v8 = vcombine.low %v220_v1, %v224_v2  ;;  %v3304_v18 = vld [vmem:[#allocation8 + $0x28] ss:$16 sps:$4 sm:$0xff]   ;;  %v3318_v20 = vld [vmem:[#allocation8 + $0x6c] ss:$16 sps:$4 sm:$0xff]  }
  0xfb   :  { %1420 = vmatpush1.bf16.msra.mxu0 %v3319_v38  ;;  %v232_v6 = vld [vmem:[#allocation5 + $0xb8] sm:$0xff]  ;;  %v3324_v22 = vld [vmem:[#allocation8 + $0x8c] ss:$16 sps:$4 sm:$0xff]   ;;  %v3322_v23 = vld [vmem:[#allocation8 + $0x88] ss:$16 sps:$4 sm:$0xff]  }
  0xfc   :  { %454 = vmatpush1.bf16.msra.mxu1 %v2908_v19  ;;  %1421 = vmatprep.subr.bf16.mxu0 %v3320_v40  ;;  %v236_v9 = vld [vmem:[#allocation5 + $0xd8] sm:$0xff]  ;;  %v2907_v11 = vcombine.high %v228_v5, %v232_v6  ;;  %v2906_v12 = vcombine.low %v228_v5, %v232_v6  ;;  %v3312_v19 = vld [vmem:[#allocation8 + $0x4c] ss:$16 sps:$4 sm:$0xff]   ;;  %v3340_v31 = vld [vmem:[#allocation8 + $0xe8] ss:$16 sps:$4 sm:$0xff]  }
  0xfd   :  { %488 = vmatprep.subr.bf16.mxu1 %v2887_v21  ;;  %v240_v10 = vld [vmem:[#allocation5 + $0xf8] sm:$0xff]  ;;  %v3316_v21 = vld [vmem:[#allocation8 + $0x68] ss:$16 sps:$4 sm:$0xff]   ;;  %v3330_v24 = vld [vmem:[#allocation8 + $0xac] ss:$16 sps:$4 sm:$0xff]  }
  0xfe   :  { %v2915_v13 = vcombine.high %v236_v9, %v240_v10  ;;  %v2914_v15 = vcombine.low %v236_v9, %v240_v10  ;;  %v3336_v27 = vld [vmem:[#allocation8 + $0xcc] ss:$16 sps:$4 sm:$0xff]   ;;  %v3337_v29 = vld [vmem:[#allocation8 + $0xc0] ss:$16 sps:$4 sm:$0xff]   ;;  %v3338_v30 = vld [vmem:[#allocation8 + $0xe4] ss:$16 sps:$4 sm:$0xff]   ;;  %v243_v10 = vlaneseq }
  0xff   :  { %2916 = vmatmul.mubr.msk.bf16.vlgmr.msra.gmra.mrb[0].mxu1 %vm443_vm0, %v4291_v25  ;;  %1422 = vmatpush1.bf16.msra.mxu0 %v3325_v44  ;;  %v3342_v32 = vld [vmem:[#allocation8 + $0xec] ss:$16 sps:$4 sm:$0xff]   ;;  %v3344_v34 = vld [vmem:[#allocation8 + $0x104] ss:$16 sps:$4 sm:$0xff]   ;;  %v3349_v37 = vld [vmem:[#allocation8 + $0x100] ss:$16 sps:$4 sm:$0xff]  }
 0x100   :  { %489 = vmatpush1.bf16.msra.mxu1 %v2886_v26  ;;  %520 = vmatprep.mubr.bf16.mxu1 %v4053_v0  ;;  %v3328_v26 = vld [vmem:[#allocation8 + $0xa8] ss:$16 sps:$4 sm:$0xff]   ;;  %v3348_v36 = vld [vmem:[#allocation8 + $0x10c] ss:$16 sps:$4 sm:$0xff]   ;;  %v3350_v38 = vld [vmem:[#allocation8 + $0x124] ss:$16 sps:$4 sm:$0xff]  }
 0x101   :  { %490 = vmatprep.subr.bf16.mxu1 %v2895_v28  ;;  %1423 = vmatprep.subr.bf16.mxu0 %v3326_v45  ;;  %v3334_v28 = vld [vmem:[#allocation8 + $0xc8] ss:$16 sps:$4 sm:$0xff]   ;;  %v3356_v42 = vld [vmem:[#allocation8 + $0x144] ss:$16 sps:$4 sm:$0xff]   ;;  %v3360_v43 = vld [vmem:[#allocation8 + $0x14c] ss:$16 sps:$4 sm:$0xff]  }
 0x102   :  { %v3352_v40 = vld [vmem:[#allocation8 + $0x128] ss:$16 sps:$4 sm:$0xff]   ;;  %v3361_v45 = vld [vmem:[#allocation8 + $0x140] ss:$16 sps:$4 sm:$0xff]   ;;  %v3366_v48 = vld [vmem:[#allocation8 + $0x16c] ss:$16 sps:$4 sm:$0xff]  }
 0x103   :  { %1424 = vmatpush1.bf16.msra.mxu0 %v3331_v50  ;;  %v3358_v44 = vld [vmem:[#allocation8 + $0x148] ss:$16 sps:$4 sm:$0xff]   ;;  %v3368_v50 = vld [vmem:[#allocation8 + $0x184] ss:$16 sps:$4 sm:$0xff]   ;;  %v3373_v53 = vld [vmem:[#allocation8 + $0x180] ss:$16 sps:$4 sm:$0xff]  }
 0x104   :  { %491 = vmatpush1.bf16.msra.mxu1 %v2894_v33  ;;  %v3343_v33 = vld [vmem:[#allocation8 + $0xe0] ss:$16 sps:$4 sm:$0xff]   ;;  %v3364_v47 = vld [vmem:[#allocation8 + $0x168] ss:$16 sps:$4 sm:$0xff]  }
 0x105   :  { %492 = vmatprep.subr.bf16.mxu1 %v2903_v35  ;;  %v3346_v35 = vld [vmem:[#allocation8 + $0x108] ss:$16 sps:$4 sm:$0xff]   ;;  %v3379_v57 = vld [vmem:[#allocation8 + $0x1a0] ss:$16 sps:$4 sm:$0xff]  }
 0x106   :  { %v3370_v52 = vld [vmem:[#allocation8 + $0x188] ss:$16 sps:$4 sm:$0xff]   ;;  %v3385_v61 = vld [vmem:[#allocation8 + $0x1c0] ss:$16 sps:$4 sm:$0xff]  }
 0x107   :  { %v3376_v56 = vld [vmem:[#allocation8 + $0x1a8] ss:$16 sps:$4 sm:$0xff]   ;;  %v3391_v2 = vld [vmem:[#allocation8 + $0x1e0] ss:$16 sps:$4 sm:$0xff]  }
 0x108   :  { %493 = vmatpush1.bf16.msra.mxu1 %v2902_v39  ;;  %v3354_v39 = vld [vmem:[#allocation8 + $0x12c] ss:$16 sps:$4 sm:$0xff]   ;;  %v3382_v60 = vld [vmem:[#allocation8 + $0x1c8] ss:$16 sps:$4 sm:$0xff]  }
 0x109   :  { %494 = vmatprep.subr.bf16.mxu1 %v2911_v41  ;;  %v3355_v41 = vld [vmem:[#allocation8 + $0x120] ss:$16 sps:$4 sm:$0xff]   ;;  %v3388_v1 = vld [vmem:[#allocation8 + $0x1e8] ss:$16 sps:$4 sm:$0xff]  }
 0x10c   :  { %495 = vmatpush1.bf16.msra.mxu1 %v2910_v46  ;;  %v3362_v46 = vld [vmem:[#allocation8 + $0x164] ss:$16 sps:$4 sm:$0xff]  }
 0x10d   :  { %529 = vmatprep.subr.bf16.mxu1 %v2889_v49  ;;  %v3367_v49 = vld [vmem:[#allocation8 + $0x160] ss:$16 sps:$4 sm:$0xff]  }
 0x10f   :  { %2917 = vmatmul.mubr.msk.bf16.vlgmr.msra.gmra.mrb[4].mxu1 %vm443_vm0, %v4291_v25 }
 0x110   :  { %530 = vmatpush1.bf16.msra.mxu1 %v2888_v51  ;;  %561 = vmatprep.mubr.bf16.mxu1 %v4053_v0  ;;  %v3372_v51 = vld [vmem:[#allocation8 + $0x18c] ss:$16 sps:$4 sm:$0xff]  }
 0x111   :  { %531 = vmatprep.subr.bf16.mxu1 %v2897_v54  ;;  %v3374_v54 = vld [vmem:[#allocation8 + $0x1a4] ss:$16 sps:$4 sm:$0xff]  }
 0x114   :  { %532 = vmatpush1.bf16.msra.mxu1 %v2896_v55  ;;  %v3378_v55 = vld [vmem:[#allocation8 + $0x1ac] ss:$16 sps:$4 sm:$0xff]  }
 0x115   :  { %533 = vmatprep.subr.bf16.mxu1 %v2905_v58  ;;  %v3380_v58 = vld [vmem:[#allocation8 + $0x1c4] ss:$16 sps:$4 sm:$0xff]  }
 0x118   :  { %534 = vmatpush1.bf16.msra.mxu1 %v2904_v59  ;;  %v3384_v59 = vld [vmem:[#allocation8 + $0x1cc] ss:$16 sps:$4 sm:$0xff]  }
 0x119   :  { %535 = vmatprep.subr.bf16.mxu1 %v2913_v62  ;;  %v3386_v62 = vld [vmem:[#allocation8 + $0x1e4] ss:$16 sps:$4 sm:$0xff]  }
 0x11c   :  { %536 = vmatpush1.bf16.msra.mxu1 %v2912_v63  ;;  %v3390_v63 = vld [vmem:[#allocation8 + $0x1ec] ss:$16 sps:$4 sm:$0xff]  }
 0x11d   :  { %570 = vmatprep.subr.bf16.mxu1 %v2891_v3  ;;  %v3394_v3 = vld [vmem:[#allocation8 + $0x204] ss:$16 sps:$4 sm:$0xff]  }
 0x11f   :  { %2918 = vmatmul.mubr.msk.bf16.vlgmr.msra.gmra.mrb[8].mxu1 %vm443_vm0, %v4291_v25 }
 0x120   :  { %571 = vmatpush1.bf16.msra.mxu1 %v2890_v4  ;;  %602 = vmatprep.mubr.bf16.mxu1 %v4053_v0  ;;  %v3310_v0 = vld [vmem:[#allocation8 + $0x48] ss:$16 sps:$4 sm:$0xff]   ;;  %v3397_v4 = vld [vmem:[#allocation8 + $0x20c] ss:$16 sps:$4 sm:$0xff]  }
 0x121   :  { %572 = vmatprep.subr.bf16.mxu1 %v2899_v7 }
 0x124   :  { %573 = vmatpush1.bf16.msra.mxu1 %v2898_v8 }
 0x125   :  { %574 = vmatprep.subr.bf16.mxu1 %v2907_v11 }
 0x128   :  { %575 = vmatpush1.bf16.msra.mxu1 %v2906_v12 }
 0x129   :  { %576 = vmatprep.subr.bf16.mxu1 %v2915_v13 }
 0x12c   :  { %577 = vmatpush1.bf16.msra.mxu1 %v2914_v15 }
 0x12d   :  { %1495 = vmatprep.subr.bf16.mxu1 %v3300_v14  ;;  %v244_v14 = vshrl.u32 %v243_v10, 7  ;;  %v3416_v10 = vld [vmem:[#allocation8 + $0x280] ss:$16 sps:$4 sm:$0xff]  }
 0x12f   :  { %2919 = vmatmul.mubr.msk.bf16.vlgmr.msra.gmra.mrb[12].mxu1 %vm443_vm0, %v4291_v25  ;;  %v3332_v25 = vld [vmem:[#allocation8 + $0xc4] ss:$16 sps:$4 sm:$0xff]   ;;  %v4306_v15 = vsub.s32 0, %v244_v14 }
 0x130   :  { %1496 = vmatpush1.bf16.msra.mxu1 %v3298_v16  ;;  %1425 = vmatprep.subr.bf16.mxu0 %v3332_v25  ;;  %v261_v16 = vsub.s32 4, %v244_v14 }
 0x131   :  { %1497 = vmatprep.subr.bf16.mxu1 %v3306_v17  ;;  %1426 = vmatpush1.bf16.msra.mxu0 %v3337_v29  ;;  %v241_v17 = vld [vmem:[#allocation7] sm:$0xff] }
 0x132   :  { %1427 = vmatprep.subr.bf16.mxu0 %v3338_v30 }
 0x134   :  { %1498 = vmatpush1.bf16.msra.mxu1 %v3304_v18  ;;  %v4308_v18 = vsub.s32 1, %v244_v14 }
 0x135   :  { %1499 = vmatprep.subr.bf16.mxu1 %v3312_v19  ;;  %1428 = vmatpush1.bf16.msra.mxu0 %v3343_v33  ;;  %v265_v19 = vsub.s32 5, %v244_v14 }
 0x136   :  { %1429 = vmatprep.subr.bf16.mxu0 %v3344_v34 }
 0x138   :  { %1500 = vmatpush1.bf16.msra.mxu1 %v3310_v0  ;;  %v246_v0 = vrot.slane %v241_v17, %v4306_v15 }
 0x139   :  { %1501 = vmatprep.subr.bf16.mxu1 %v3318_v20  ;;  %1430 = vmatpush1.bf16.msra.mxu0 %v3349_v37  ;;  %v262_v20 = vrot.slane %v241_v17, %v261_v16  ;;  %v3395_v37 = vld [vmem:[#allocation8 + $0x208] ss:$16 sps:$4 sm:$0xff]  }
 0x13a   :  { %1431 = vmatprep.subr.bf16.mxu0 %v3350_v38  ;;  %v4312_v38 = vsub.s32 2, %v244_v14  ;;  %v3425_v16 = vld [vmem:[#allocation8 + $0x2a8] ss:$16 sps:$4 sm:$0xff]  }
 0x13c   :  { %1502 = vmatpush1.bf16.msra.mxu1 %v3316_v21  ;;  %v250_v21 = vrot.slane %v241_v17, %v4308_v18 }
 0x13d   :  { %1503 = vmatprep.subr.bf16.mxu1 %v3324_v22  ;;  %1432 = vmatpush1.bf16.msra.mxu0 %v3355_v41  ;;  %v266_v22 = vrot.slane %v241_v17, %v265_v19  ;;  %v3403_v41 = vld [vmem:[#allocation8 + $0x22c] ss:$16 sps:$4 sm:$0xff]  }
 0x13e   :  { %1433 = vmatprep.subr.bf16.mxu0 %v3356_v42  ;;  %v269_v42 = vsub.s32 6, %v244_v14  ;;  %v3433_v19 = vld [vmem:[#allocation8 + $0x2cc] ss:$16 sps:$4 sm:$0xff]  }
 0x140   :  { %1504 = vmatpush1.bf16.msra.mxu1 %v3322_v23 }
 0x141   :  { %1505 = vmatprep.subr.bf16.mxu1 %v3330_v24  ;;  %1434 = vmatpush1.bf16.msra.mxu0 %v3361_v45  ;;  %v3398_v45 = vld [vmem:[#allocation8 + $0x220] ss:$16 sps:$4 sm:$0xff]  }
 0x142   :  { %1435 = vmatprep.subr.bf16.mxu0 %v3362_v46  ;;  %v3401_v46 = vld [vmem:[#allocation8 + $0x228] ss:$16 sps:$4 sm:$0xff]  }
 0x144   :  { %1506 = vmatpush1.bf16.msra.mxu1 %v3328_v26 }
 0x145   :  { %1507 = vmatprep.subr.bf16.mxu1 %v3336_v27  ;;  %1436 = vmatpush1.bf16.msra.mxu0 %v3367_v49  ;;  %v3406_v49 = vld [vmem:[#allocation8 + $0x244] ss:$16 sps:$4 sm:$0xff]  }
 0x146   :  { %1437 = vmatprep.subr.bf16.mxu0 %v3368_v50  ;;  %v3409_v50 = vld [vmem:[#allocation8 + $0x24c] ss:$16 sps:$4 sm:$0xff]  }
 0x148   :  { %1508 = vmatpush1.bf16.msra.mxu1 %v3334_v28 }
 0x149   :  { %1509 = vmatprep.subr.bf16.mxu1 %v3342_v32  ;;  %1438 = vmatpush1.bf16.msra.mxu0 %v3373_v53 }
 0x14a   :  { %1439 = vmatprep.subr.bf16.mxu0 %v3374_v54  ;;  %v3404_v54 = vld [vmem:[#allocation8 + $0x240] ss:$16 sps:$4 sm:$0xff]  }
 0x14c   :  { %1510 = vmatpush1.bf16.msra.mxu1 %v3340_v31 }
 0x14d   :  { %1511 = vmatprep.subr.bf16.mxu1 %v3348_v36  ;;  %1440 = vmatpush1.bf16.msra.mxu0 %v3379_v57  ;;  %v3392_v36 = vld [vmem:[#allocation8 + $0x200] ss:$16 sps:$4 sm:$0xff]  }
 0x14e   :  { %1441 = vmatprep.subr.bf16.mxu0 %v3380_v58 }
 0x150   :  { %1512 = vmatpush1.bf16.msra.mxu1 %v3346_v35 }
 0x151   :  { %1513 = vmatprep.subr.bf16.mxu1 %v3354_v39  ;;  %1442 = vmatpush1.bf16.msra.mxu0 %v3385_v61 }
 0x152   :  { %1443 = vmatprep.subr.bf16.mxu0 %v3386_v62 }
 0x154   :  { %1514 = vmatpush1.bf16.msra.mxu1 %v3352_v40  ;;  %v3400_v40 = vld [vmem:[#allocation8 + $0x224] ss:$16 sps:$4 sm:$0xff]  }
 0x155   :  { %1515 = vmatprep.subr.bf16.mxu1 %v3360_v43  ;;  %1444 = vmatpush1.bf16.msra.mxu0 %v3391_v2  ;;  %v4314_v43 = vsub.s32 3, %v244_v14 }
 0x156   :  { %1454 = vmatprep.subr.bf16.mxu0 %v3394_v3 }
 0x158   :  { %1516 = vmatpush1.bf16.msra.mxu1 %v3358_v44  ;;  %v273_v44 = vsub.s32 7, %v244_v14  ;;  %v3422_v14 = vld [vmem:[#allocation8 + $0x2a0] ss:$16 sps:$4 sm:$0xff]  }
 0x159   :  { %1517 = vmatprep.subr.bf16.mxu1 %v3366_v48  ;;  %v270_v48 = vrot.slane %v241_v17, %v269_v42  ;;  %v3466_v42 = vld [vmem:[#allocation8 + $0x384] ss:$16 sps:$4 sm:$0xff]  }
 0x15c   :  { %1518 = vmatpush1.bf16.msra.mxu1 %v3364_v47  ;;  %v254_v47 = vrot.slane %v241_v17, %v4312_v38 }
 0x15d   :  { %1519 = vmatprep.subr.bf16.mxu1 %v3372_v51  ;;  %v258_v51 = vrot.slane %v241_v17, %v4314_v43 }
 0x160   :  { %1520 = vmatpush1.bf16.msra.mxu1 %v3370_v52  ;;  %v274_v52 = vrot.slane %v241_v17, %v273_v44  ;;  %v3430_v17 = vld [vmem:[#allocation8 + $0x2c4] ss:$16 sps:$4 sm:$0xff]   ;;  %v3469_v44 = vld [vmem:[#allocation8 + $0x38c] ss:$16 sps:$4 sm:$0xff]  }
 0x161   :  { %1521 = vmatprep.subr.bf16.mxu1 %v3378_v55  ;;  %v3407_v55 = vld [vmem:[#allocation8 + $0x248] ss:$16 sps:$4 sm:$0xff]  }
 0x164   :  { %1522 = vmatpush1.bf16.msra.mxu1 %v3376_v56 }
 0x165   :  { %1523 = vmatprep.subr.bf16.mxu1 %v3384_v59  ;;  %v3412_v59 = vld [vmem:[#allocation8 + $0x264] ss:$16 sps:$4 sm:$0xff]  }
 0x168   :  { %1524 = vmatpush1.bf16.msra.mxu1 %v3382_v60  ;;  %v3415_v60 = vld [vmem:[#allocation8 + $0x26c] ss:$16 sps:$4 sm:$0xff]  }
 0x169   :  { %1525 = vmatprep.subr.bf16.mxu1 %v3390_v63 }
 0x16c   :  { %1526 = vmatpush1.bf16.msra.mxu1 %v3388_v1 }
 0x16d   :  { %1536 = vmatprep.subr.bf16.mxu1 %v3397_v4  ;;  %v3410_v4 = vld [vmem:[#allocation8 + $0x260] ss:$16 sps:$4 sm:$0xff]  }
 0x1d2   :  { %v481_v5 = vpop.f32.mrb[0].mxu1 }
 0x1d3   :  { %v483_v6 = vpop.f32.mrb[1].mxu1  ;;  %v482_v24 = vadd.f32 %v481_v5, %v246_v0  ;;  %v3413_v5 = vld [vmem:[#allocation8 + $0x268] ss:$16 sps:$4 sm:$0xff]   ;;  %v3428_v0 = vld [vmem:[#allocation8 + $0x2c0] ss:$16 sps:$4 sm:$0xff]  }
 0x1d4   :  { %v485_v7 = vpop.f32.mrb[2].mxu1  ;;  %v484_v27 = vadd.f32 %v483_v6, %v250_v21  ;;  %v3418_v6 = vld [vmem:[#allocation8 + $0x284] ss:$16 sps:$4 sm:$0xff]  }
 0x1d5   :  { %v486_v8 = vpop.f32.mrb[3].mxu1  ;;  %v3421_v7 = vld [vmem:[#allocation8 + $0x28c] ss:$16 sps:$4 sm:$0xff]   ;;  %v3436_v21 = vld [vmem:[#allocation8 + $0x2e4] ss:$16 sps:$4 sm:$0xff]  }
 0x1e2   :  { %v522_v9 = vpop.f32.mrb[4].mxu1 }
 0x1e3   :  { %v4304_v11 = vpop.f32.mrb[5].mxu1  ;;  %v4318_v56 = vadd.f32 %v522_v9, %v254_v47  ;;  %v3472_v47 = vld [vmem:[#allocation8 + $0x3a4] ss:$16 sps:$4 sm:$0xff]  }
 0x1e4   :  { %v526_v12 = vpop.f32.mrb[6].mxu1  ;;  %v525_v61 = vadd.f32 %v4304_v11, %v258_v51  ;;  %v3419_v11 = vld [vmem:[#allocation8 + $0x288] ss:$16 sps:$4 sm:$0xff]   ;;  %v3478_v51 = vld [vmem:[#allocation8 + $0x3c4] ss:$16 sps:$4 sm:$0xff]  }
 0x1e5   :  { %v527_v13 = vpop.f32.mrb[7].mxu1  ;;  %v3424_v12 = vld [vmem:[#allocation8 + $0x2a4] ss:$16 sps:$4 sm:$0xff]  }
 0x1e6   :  { %v3427_v13 = vld [vmem:[#allocation8 + $0x2ac] ss:$16 sps:$4 sm:$0xff]  }
 0x1f2   :  { %v563_v23 = vpop.f32.mrb[8].mxu1 }
 0x1f3   :  { %v564_v26 = vadd.f32 %v563_v23, %v262_v20  ;;  %v565_v25 = vpop.f32.mrb[9].mxu1  ;;  %v3431_v20 = vld [vmem:[#allocation8 + $0x2c8] ss:$16 sps:$4 sm:$0xff]   ;;  %v3434_v23 = vld [vmem:[#allocation8 + $0x2e0] ss:$16 sps:$4 sm:$0xff]  }
 0x1f4   :  { %v566_v28 = vadd.f32 %v565_v25, %v266_v22  ;;  %v567_v29 = vpop.f32.mrb[10].mxu1  ;;  %v3439_v22 = vld [vmem:[#allocation8 + $0x2ec] ss:$16 sps:$4 sm:$0xff]  }
 0x1f5   :  { %v611_v30 = vmax.f32 %v482_v24, %v564_v26  ;;  %v568_v31 = vpop.f32.mrb[11].mxu1  ;;  %v3437_v24 = vld [vmem:[#allocation8 + $0x2e8] ss:$16 sps:$4 sm:$0xff]   ;;  %v3442_v26 = vld [vmem:[#allocation8 + $0x304] ss:$16 sps:$4 sm:$0xff]  }
 0x1f6   :  { %v612_v32 = vmax.f32 %v484_v27, %v566_v28  ;;  %v3445_v25 = vld [vmem:[#allocation8 + $0x30c] ss:$16 sps:$4 sm:$0xff]   ;;  %v3440_v27 = vld [vmem:[#allocation8 + $0x300] ss:$16 sps:$4 sm:$0xff]   ;;  %v3443_v28 = vld [vmem:[#allocation8 + $0x308] ss:$16 sps:$4 sm:$0xff]  }
 0x1f7   :  { %v615_v33 = vmax.f32 %v611_v30, 0.0  ;;  %v3448_v29 = vld [vmem:[#allocation8 + $0x324] ss:$16 sps:$4 sm:$0xff]   ;;  %v3451_v30 = vld [vmem:[#allocation8 + $0x32c] ss:$16 sps:$4 sm:$0xff]  }
 0x1f8   :  { %v616_v34 = vmax.f32 %v612_v32, 0.0  ;;  %v3446_v31 = vld [vmem:[#allocation8 + $0x320] ss:$16 sps:$4 sm:$0xff]   ;;  %v3449_v32 = vld [vmem:[#allocation8 + $0x328] ss:$16 sps:$4 sm:$0xff]  }
 0x1f9   :  { %v619_v39 = vpack.c.bf16 %v615_v33, %v615_v33  ;;  %v3454_v33 = vld [vmem:[#allocation8 + $0x344] ss:$16 sps:$4 sm:$0xff]  }
 0x1fa   :  { %v620_v35 = vpack.c.bf16 %v616_v34, %v616_v34  ;;  %v3457_v34 = vld [vmem:[#allocation8 + $0x34c] ss:$16 sps:$4 sm:$0xff]  }
 0x1fc   :  { %1445 = vmatprep.mubr.bf16.mxu0 %v620_v35  ;;  %1527 = vmatprep.mubr.bf16.mxu1 %v620_v35  ;;  %v3452_v35 = vld [vmem:[#allocation8 + $0x340] ss:$16 sps:$4 sm:$0xff]  }
 0x1fd   :  { %1446 = vmatmul.mubr.bf16.vlgmr.msra.gmra.mrb[0].mxu0 %v619_v39  ;;  %1528 = vmatmul.mubr.bf16.vlgmr.msra.gmra.mrb[16].mxu1 %v619_v39  ;;  %v3463_v39 = vld [vmem:[#allocation8 + $0x36c] ss:$16 sps:$4 sm:$0xff]  }
 0x1fe   :  { %1455 = vmatpush1.bf16.msra.mxu0 %v3392_v36  ;;  %1537 = vmatpush1.bf16.msra.mxu1 %v3395_v37  ;;  %v3455_v36 = vld [vmem:[#allocation8 + $0x348] ss:$16 sps:$4 sm:$0xff]   ;;  %v3460_v37 = vld [vmem:[#allocation8 + $0x364] ss:$16 sps:$4 sm:$0xff]  }
 0x1ff   :  { %1456 = vmatprep.subr.bf16.mxu0 %v3400_v40  ;;  %1538 = vmatprep.subr.bf16.mxu1 %v3403_v41  ;;  %v3458_v40 = vld [vmem:[#allocation8 + $0x360] ss:$16 sps:$4 sm:$0xff]   ;;  %v3461_v41 = vld [vmem:[#allocation8 + $0x368] ss:$16 sps:$4 sm:$0xff]  }
 0x202   :  { %1457 = vmatpush1.bf16.msra.mxu0 %v3398_v45  ;;  %1539 = vmatpush1.bf16.msra.mxu1 %v3401_v46  ;;  %v604_v53 = vpop.f32.mrb[12].mxu1  ;;  %v3464_v45 = vld [vmem:[#allocation8 + $0x380] ss:$16 sps:$4 sm:$0xff]   ;;  %v3467_v46 = vld [vmem:[#allocation8 + $0x388] ss:$16 sps:$4 sm:$0xff]  }
 0x203   :  { %v4320_v57 = vadd.f32 %v604_v53, %v270_v48  ;;  %v606_v58 = vpop.f32.mrb[13].mxu1  ;;  %1458 = vmatprep.subr.bf16.mxu0 %v3406_v49  ;;  %1540 = vmatprep.subr.bf16.mxu1 %v3409_v50  ;;  %v3475_v48 = vld [vmem:[#allocation8 + $0x3ac] ss:$16 sps:$4 sm:$0xff]   ;;  %v3470_v49 = vld [vmem:[#allocation8 + $0x3a0] ss:$16 sps:$4 sm:$0xff]  }
 0x204   :  { %v607_v62 = vadd.f32 %v606_v58, %v274_v52  ;;  %v608_v63 = vpop.f32.mrb[14].mxu1  ;;  %v3473_v50 = vld [vmem:[#allocation8 + $0x3a8] ss:$16 sps:$4 sm:$0xff]   ;;  %v3481_v52 = vld [vmem:[#allocation8 + $0x3cc] ss:$16 sps:$4 sm:$0xff]  }
 0x205   :  { %v613_v1 = vmax.f32 %v4318_v56, %v4320_v57  ;;  %v609_v2 = vpop.f32.mrb[15].mxu1  ;;  %v3476_v53 = vld [vmem:[#allocation8 + $0x3c0] ss:$16 sps:$4 sm:$0xff]   ;;  %v3487_v58 = vld [vmem:[#allocation8 + $0x3ec] ss:$16 sps:$4 sm:$0xff]  }
 0x206   :  { %v614_v3 = vmax.f32 %v525_v61, %v607_v62  ;;  %1459 = vmatpush1.bf16.msra.mxu0 %v3404_v54  ;;  %1541 = vmatpush1.bf16.msra.mxu1 %v3407_v55  ;;  %v3479_v54 = vld [vmem:[#allocation8 + $0x3c8] ss:$16 sps:$4 sm:$0xff]   ;;  %v3484_v55 = vld [vmem:[#allocation8 + $0x3e4] ss:$16 sps:$4 sm:$0xff]   ;;  %v3493_v63 = vld [vmem:[#allocation11 + $0xc] ss:$16 sps:$4 sm:$0xff]  }
 0x207   :  { %1460 = vmatprep.subr.bf16.mxu0 %v3412_v59  ;;  %1542 = vmatprep.subr.bf16.mxu1 %v3415_v60  ;;  %v3482_v59 = vld [vmem:[#allocation8 + $0x3e0] ss:$16 sps:$4 sm:$0xff]   ;;  %v3485_v60 = vld [vmem:[#allocation8 + $0x3e8] ss:$16 sps:$4 sm:$0xff]   ;;  %v617_v61 = vmax.f32 %v613_v1, 0.0 }
 0x208   :  { %v618_v8 = vmax.f32 %v614_v3, 0.0  ;;  %v3490_v62 = vld [vmem:[#allocation11 + $0x4] ss:$16 sps:$4 sm:$0xff]   ;;  %v3488_v2 = vld [vmem:[#allocation11] ss:$16 sps:$4 sm:$0xff]  }
 0x209   :  { %v3491_v3 = vld [vmem:[#allocation11 + $0x8] ss:$16 sps:$4 sm:$0xff]   ;;  %v3502_v57 = vld [vmem:[#allocation11 + $0x44] ss:$16 sps:$4 sm:$0xff]   ;;  %v3505_v1 = vld [vmem:[#allocation11 + $0x4c] ss:$16 sps:$4 sm:$0xff]  }
 0x20a   :  { %v622_v9 = vpack.c.bf16 %v618_v8, %v618_v8  ;;  %1461 = vmatpush1.bf16.msra.mxu0 %v3410_v4  ;;  %1543 = vmatpush1.bf16.msra.mxu1 %v3413_v5  ;;  %v621_v4 = vpack.c.bf16 %v617_v61, %v617_v61  ;;  %v3496_v5 = vld [vmem:[#allocation11 + $0x24] ss:$16 sps:$4 sm:$0xff]   ;;  %v3497_v56 = vld [vmem:[#allocation11 + $0x28] ss:$16 sps:$4 sm:$0xff]   ;;  %v3500_v8 = vld [vmem:[#allocation11 + $0x40] ss:$16 sps:$4 sm:$0xff]  }
 0x20b   :  { %1462 = vmatprep.subr.bf16.mxu0 %v3418_v6  ;;  %1544 = vmatprep.subr.bf16.mxu1 %v3421_v7  ;;  %v3499_v6 = vld [vmem:[#allocation11 + $0x2c] ss:$16 sps:$4 sm:$0xff]   ;;  %v3494_v7 = vld [vmem:[#allocation11 + $0x20] ss:$16 sps:$4 sm:$0xff]  }
 0x20c   :  { %1486 = vmatprep.mubr.bf16.mxu0 %v622_v9  ;;  %1568 = vmatprep.mubr.bf16.mxu1 %v622_v9  ;;  %v3503_v9 = vld [vmem:[#allocation11 + $0x48] ss:$16 sps:$4 sm:$0xff]   ;;  %v3572_v61 = vld [vmem:[#allocation11 + $0x1c0] ss:$16 sps:$4 sm:$0xff]  }
 0x20e   :  { %1463 = vmatpush1.bf16.msra.mxu0 %v3416_v10  ;;  %1545 = vmatpush1.bf16.msra.mxu1 %v3419_v11  ;;  %v3508_v10 = vld [vmem:[#allocation11 + $0x64] ss:$16 sps:$4 sm:$0xff]   ;;  %v3511_v11 = vld [vmem:[#allocation11 + $0x6c] ss:$16 sps:$4 sm:$0xff]  }
 0x20f   :  { %1464 = vmatprep.subr.bf16.mxu0 %v3424_v12  ;;  %1546 = vmatprep.subr.bf16.mxu1 %v3427_v13  ;;  %v3506_v12 = vld [vmem:[#allocation11 + $0x60] ss:$16 sps:$4 sm:$0xff]   ;;  %v3509_v13 = vld [vmem:[#allocation11 + $0x68] ss:$16 sps:$4 sm:$0xff]  }
 0x212   :  { %1465 = vmatpush1.bf16.msra.mxu0 %v3422_v14  ;;  %1547 = vmatpush1.bf16.msra.mxu1 %v3425_v16  ;;  %v3514_v14 = vld [vmem:[#allocation11 + $0x84] ss:$16 sps:$4 sm:$0xff]   ;;  %v3517_v16 = vld [vmem:[#allocation11 + $0x8c] ss:$16 sps:$4 sm:$0xff]  }
 0x213   :  { %1466 = vmatprep.subr.bf16.mxu0 %v3430_v17  ;;  %1548 = vmatprep.subr.bf16.mxu1 %v3433_v19  ;;  %v3512_v17 = vld [vmem:[#allocation11 + $0x80] ss:$16 sps:$4 sm:$0xff]   ;;  %v3515_v19 = vld [vmem:[#allocation11 + $0x88] ss:$16 sps:$4 sm:$0xff]  }
 0x216   :  { %1467 = vmatpush1.bf16.msra.mxu0 %v3428_v0  ;;  %1549 = vmatpush1.bf16.msra.mxu1 %v3431_v20  ;;  %v3520_v0 = vld [vmem:[#allocation11 + $0xa4] ss:$16 sps:$4 sm:$0xff]   ;;  %v3523_v20 = vld [vmem:[#allocation11 + $0xac] ss:$16 sps:$4 sm:$0xff]  }
 0x217   :  { %1468 = vmatprep.subr.bf16.mxu0 %v3436_v21  ;;  %1550 = vmatprep.subr.bf16.mxu1 %v3439_v22  ;;  %v3518_v21 = vld [vmem:[#allocation11 + $0xa0] ss:$16 sps:$4 sm:$0xff]   ;;  %v3521_v22 = vld [vmem:[#allocation11 + $0xa8] ss:$16 sps:$4 sm:$0xff]  }
 0x21a   :  { %1469 = vmatpush1.bf16.msra.mxu0 %v3434_v23  ;;  %1551 = vmatpush1.bf16.msra.mxu1 %v3437_v24  ;;  %v3526_v23 = vld [vmem:[#allocation11 + $0xc4] ss:$16 sps:$4 sm:$0xff]   ;;  %v3529_v24 = vld [vmem:[#allocation11 + $0xcc] ss:$16 sps:$4 sm:$0xff]  }
 0x21b   :  { %1470 = vmatprep.subr.bf16.mxu0 %v3442_v26  ;;  %1552 = vmatprep.subr.bf16.mxu1 %v3445_v25  ;;  %v3524_v26 = vld [vmem:[#allocation11 + $0xc0] ss:$16 sps:$4 sm:$0xff]   ;;  %v3527_v25 = vld [vmem:[#allocation11 + $0xc8] ss:$16 sps:$4 sm:$0xff]  }
 0x21e   :  { %1471 = vmatpush1.bf16.msra.mxu0 %v3440_v27  ;;  %1553 = vmatpush1.bf16.msra.mxu1 %v3443_v28  ;;  %v3532_v27 = vld [vmem:[#allocation11 + $0xe4] ss:$16 sps:$4 sm:$0xff]   ;;  %v3535_v28 = vld [vmem:[#allocation11 + $0xec] ss:$16 sps:$4 sm:$0xff]  }
 0x21f   :  { %1472 = vmatprep.subr.bf16.mxu0 %v3448_v29  ;;  %1554 = vmatprep.subr.bf16.mxu1 %v3451_v30  ;;  %v3530_v29 = vld [vmem:[#allocation11 + $0xe0] ss:$16 sps:$4 sm:$0xff]   ;;  %v3533_v30 = vld [vmem:[#allocation11 + $0xe8] ss:$16 sps:$4 sm:$0xff]  }
 0x222   :  { %1473 = vmatpush1.bf16.msra.mxu0 %v3446_v31  ;;  %1555 = vmatpush1.bf16.msra.mxu1 %v3449_v32  ;;  %v3538_v31 = vld [vmem:[#allocation11 + $0x104] ss:$16 sps:$4 sm:$0xff]   ;;  %v3541_v32 = vld [vmem:[#allocation11 + $0x10c] ss:$16 sps:$4 sm:$0xff]  }
 0x223   :  { %1474 = vmatprep.subr.bf16.mxu0 %v3454_v33  ;;  %1556 = vmatprep.subr.bf16.mxu1 %v3457_v34  ;;  %v3536_v33 = vld [vmem:[#allocation11 + $0x100] ss:$16 sps:$4 sm:$0xff]   ;;  %v3539_v34 = vld [vmem:[#allocation11 + $0x108] ss:$16 sps:$4 sm:$0xff]  }
 0x226   :  { %1475 = vmatpush1.bf16.msra.mxu0 %v3452_v35  ;;  %1557 = vmatpush1.bf16.msra.mxu1 %v3455_v36  ;;  %v3544_v35 = vld [vmem:[#allocation11 + $0x124] ss:$16 sps:$4 sm:$0xff]   ;;  %v3547_v36 = vld [vmem:[#allocation11 + $0x12c] ss:$16 sps:$4 sm:$0xff]  }
 0x227   :  { %1476 = vmatprep.subr.bf16.mxu0 %v3460_v37  ;;  %1558 = vmatprep.subr.bf16.mxu1 %v3463_v39  ;;  %v3542_v37 = vld [vmem:[#allocation11 + $0x120] ss:$16 sps:$4 sm:$0xff]   ;;  %v3545_v39 = vld [vmem:[#allocation11 + $0x128] ss:$16 sps:$4 sm:$0xff]  }
 0x22a   :  { %1477 = vmatpush1.bf16.msra.mxu0 %v3458_v40  ;;  %1559 = vmatpush1.bf16.msra.mxu1 %v3461_v41  ;;  %v3550_v40 = vld [vmem:[#allocation11 + $0x144] ss:$16 sps:$4 sm:$0xff]   ;;  %v3553_v41 = vld [vmem:[#allocation11 + $0x14c] ss:$16 sps:$4 sm:$0xff]  }
 0x22b   :  { %1478 = vmatprep.subr.bf16.mxu0 %v3466_v42  ;;  %1560 = vmatprep.subr.bf16.mxu1 %v3469_v44  ;;  %v3548_v42 = vld [vmem:[#allocation11 + $0x140] ss:$16 sps:$4 sm:$0xff]   ;;  %v3551_v44 = vld [vmem:[#allocation11 + $0x148] ss:$16 sps:$4 sm:$0xff]  }
 0x22e   :  { %1479 = vmatpush1.bf16.msra.mxu0 %v3464_v45  ;;  %1561 = vmatpush1.bf16.msra.mxu1 %v3467_v46  ;;  %v3556_v45 = vld [vmem:[#allocation11 + $0x164] ss:$16 sps:$4 sm:$0xff]   ;;  %v3559_v46 = vld [vmem:[#allocation11 + $0x16c] ss:$16 sps:$4 sm:$0xff]  }
 0x22f   :  { %1480 = vmatprep.subr.bf16.mxu0 %v3472_v47  ;;  %1562 = vmatprep.subr.bf16.mxu1 %v3475_v48  ;;  %v3554_v47 = vld [vmem:[#allocation11 + $0x160] ss:$16 sps:$4 sm:$0xff]   ;;  %v3557_v48 = vld [vmem:[#allocation11 + $0x168] ss:$16 sps:$4 sm:$0xff]  }
 0x232   :  { %1481 = vmatpush1.bf16.msra.mxu0 %v3470_v49  ;;  %1563 = vmatpush1.bf16.msra.mxu1 %v3473_v50  ;;  %v3562_v49 = vld [vmem:[#allocation11 + $0x184] ss:$16 sps:$4 sm:$0xff]   ;;  %v3565_v50 = vld [vmem:[#allocation11 + $0x18c] ss:$16 sps:$4 sm:$0xff]  }
 0x233   :  { %1482 = vmatprep.subr.bf16.mxu0 %v3478_v51  ;;  %1564 = vmatprep.subr.bf16.mxu1 %v3481_v52  ;;  %v3560_v51 = vld [vmem:[#allocation11 + $0x180] ss:$16 sps:$4 sm:$0xff]   ;;  %v3563_v52 = vld [vmem:[#allocation11 + $0x188] ss:$16 sps:$4 sm:$0xff]  }
 0x236   :  { %1483 = vmatpush1.bf16.msra.mxu0 %v3476_v53  ;;  %1565 = vmatpush1.bf16.msra.mxu1 %v3479_v54  ;;  %v3568_v53 = vld [vmem:[#allocation11 + $0x1a4] ss:$16 sps:$4 sm:$0xff]   ;;  %v3571_v54 = vld [vmem:[#allocation11 + $0x1ac] ss:$16 sps:$4 sm:$0xff]  }
 0x237   :  { %1484 = vmatprep.subr.bf16.mxu0 %v3484_v55  ;;  %1566 = vmatprep.subr.bf16.mxu1 %v3487_v58  ;;  %v3566_v55 = vld [vmem:[#allocation11 + $0x1a0] ss:$16 sps:$4 sm:$0xff]   ;;  %v3569_v58 = vld [vmem:[#allocation11 + $0x1a8] ss:$16 sps:$4 sm:$0xff]  }
 0x23a   :  { %1485 = vmatpush1.bf16.msra.mxu0 %v3482_v59  ;;  %1567 = vmatpush1.bf16.msra.mxu1 %v3485_v60  ;;  %v3574_v59 = vld [vmem:[#allocation11 + $0x1c4] ss:$16 sps:$4 sm:$0xff]   ;;  %v3577_v60 = vld [vmem:[#allocation11 + $0x1cc] ss:$16 sps:$4 sm:$0xff]  }
 0x23b   :  { %1989 = vmatprep.subr.bf16.mxu0 %v3490_v62  ;;  %2030 = vmatprep.subr.bf16.mxu1 %v3493_v63  ;;  %v3575_v62 = vld [vmem:[#allocation11 + $0x1c8] ss:$16 sps:$4 sm:$0xff]   ;;  %v3580_v63 = vld [vmem:[#allocation11 + $0x1e4] ss:$16 sps:$4 sm:$0xff]  }
 0x23d   :  { %1487 = vmatmul.mubr.bf16.vlgmr.msra.gmra.mrb[0].mxu0 %v621_v4  ;;  %1569 = vmatmul.mubr.bf16.vlgmr.msra.gmra.mrb[16].mxu1 %v621_v4  ;;  %v3581_v4 = vld [vmem:[#allocation11 + $0x1e8] ss:$16 sps:$4 sm:$0xff]  }
 0x23e   :  { %1990 = vmatpush1.bf16.msra.mxu0 %v3488_v2  ;;  %2031 = vmatpush1.bf16.msra.mxu1 %v3491_v3  ;;  %v3583_v2 = vld [vmem:[#allocation11 + $0x1ec] ss:$16 sps:$4 sm:$0xff]   ;;  %v3578_v3 = vld [vmem:[#allocation11 + $0x1e0] ss:$16 sps:$4 sm:$0xff]  }
 0x23f   :  { %1991 = vmatprep.subr.bf16.mxu0 %v3496_v5  ;;  %2032 = vmatprep.subr.bf16.mxu1 %v3499_v6  ;;  %v3586_v5 = vld [vmem:[#allocation14 + $0x4] ss:$8 sps:$4 sm:$0xff]   ;;  %v751_v6 = vld [vmem:[#allocation10] sm:$0xf] }
 0x242   :  { %1992 = vmatpush1.bf16.msra.mxu0 %v3494_v7  ;;  %2033 = vmatpush1.bf16.msra.mxu1 %v3497_v56  ;;  %v756_v7 = vrot.slane %v751_v6, %v4306_v15  ;;  %v764_v56 = vrot.slane %v751_v6, %v4312_v38 }
 0x243   :  { %1993 = vmatprep.subr.bf16.mxu0 %v3502_v57  ;;  %2034 = vmatprep.subr.bf16.mxu1 %v3505_v1  ;;  %v760_v57 = vrot.slane %v751_v6, %v4308_v18  ;;  %v768_v1 = vrot.slane %v751_v6, %v4314_v43  ;;  %v3685_v6 = vld [vmem:[#allocation17 + $0x10] sm:$0xff]  }
 0x246   :  { %1994 = vmatpush1.bf16.msra.mxu0 %v3500_v8  ;;  %2035 = vmatpush1.bf16.msra.mxu1 %v3503_v9 }
 0x247   :  { %1995 = vmatprep.subr.bf16.mxu0 %v3508_v10  ;;  %2036 = vmatprep.subr.bf16.mxu1 %v3511_v11 }
 0x24a   :  { %1996 = vmatpush1.bf16.msra.mxu0 %v3506_v12  ;;  %2037 = vmatpush1.bf16.msra.mxu1 %v3509_v13 }
 0x24b   :  { %1997 = vmatprep.subr.bf16.mxu0 %v3514_v14  ;;  %2038 = vmatprep.subr.bf16.mxu1 %v3517_v16 }
 0x24e   :  { %1998 = vmatpush1.bf16.msra.mxu0 %v3512_v17  ;;  %2039 = vmatpush1.bf16.msra.mxu1 %v3515_v19 }
 0x24f   :  { %1999 = vmatprep.subr.bf16.mxu0 %v3520_v0  ;;  %2040 = vmatprep.subr.bf16.mxu1 %v3523_v20 }
 0x252   :  { %2000 = vmatpush1.bf16.msra.mxu0 %v3518_v21  ;;  %2041 = vmatpush1.bf16.msra.mxu1 %v3521_v22 }
 0x253   :  { %2001 = vmatprep.subr.bf16.mxu0 %v3526_v23  ;;  %2042 = vmatprep.subr.bf16.mxu1 %v3529_v24 }
 0x256   :  { %2002 = vmatpush1.bf16.msra.mxu0 %v3524_v26  ;;  %2043 = vmatpush1.bf16.msra.mxu1 %v3527_v25  ;;  %v3584_v25 = vld [vmem:[#allocation14] ss:$8 sps:$4 sm:$0xff]  }
 0x257   :  { %2003 = vmatprep.subr.bf16.mxu0 %v3532_v27  ;;  %2044 = vmatprep.subr.bf16.mxu1 %v3535_v28  ;;  %v3589_v28 = vld [vmem:[#allocation14 + $0x14] ss:$8 sps:$4 sm:$0xff]  }
 0x25a   :  { %2004 = vmatpush1.bf16.msra.mxu0 %v3530_v29  ;;  %2045 = vmatpush1.bf16.msra.mxu1 %v3533_v30  ;;  %v3587_v29 = vld [vmem:[#allocation14 + $0x10] ss:$8 sps:$4 sm:$0xff]   ;;  %v3592_v30 = vld [vmem:[#allocation14 + $0x24] ss:$8 sps:$4 sm:$0xff]  }
 0x25b   :  { %2005 = vmatprep.subr.bf16.mxu0 %v3538_v31  ;;  %2046 = vmatprep.subr.bf16.mxu1 %v3541_v32  ;;  %v3590_v31 = vld [vmem:[#allocation14 + $0x20] ss:$8 sps:$4 sm:$0xff]   ;;  %v3595_v32 = vld [vmem:[#allocation14 + $0x34] ss:$8 sps:$4 sm:$0xff]  }
 0x25e   :  { %2006 = vmatpush1.bf16.msra.mxu0 %v3536_v33  ;;  %2047 = vmatpush1.bf16.msra.mxu1 %v3539_v34  ;;  %v3593_v33 = vld [vmem:[#allocation14 + $0x30] ss:$8 sps:$4 sm:$0xff]   ;;  %v3598_v34 = vld [vmem:[#allocation14 + $0x44] ss:$8 sps:$4 sm:$0xff]  }
 0x25f   :  { %2007 = vmatprep.subr.bf16.mxu0 %v3544_v35  ;;  %2048 = vmatprep.subr.bf16.mxu1 %v3547_v36  ;;  %v3596_v35 = vld [vmem:[#allocation14 + $0x40] ss:$8 sps:$4 sm:$0xff]   ;;  %v3601_v36 = vld [vmem:[#allocation14 + $0x54] ss:$8 sps:$4 sm:$0xff]  }
 0x262   :  { %2008 = vmatpush1.bf16.msra.mxu0 %v3542_v37  ;;  %2049 = vmatpush1.bf16.msra.mxu1 %v3545_v39  ;;  %v3599_v37 = vld [vmem:[#allocation14 + $0x50] ss:$8 sps:$4 sm:$0xff]   ;;  %v3604_v39 = vld [vmem:[#allocation14 + $0x64] ss:$8 sps:$4 sm:$0xff]  }
 0x263   :  { %2009 = vmatprep.subr.bf16.mxu0 %v3550_v40  ;;  %2050 = vmatprep.subr.bf16.mxu1 %v3553_v41  ;;  %v3602_v40 = vld [vmem:[#allocation14 + $0x60] ss:$8 sps:$4 sm:$0xff]   ;;  %v3607_v41 = vld [vmem:[#allocation14 + $0x74] ss:$8 sps:$4 sm:$0xff]  }
 0x266   :  { %2010 = vmatpush1.bf16.msra.mxu0 %v3548_v42  ;;  %2051 = vmatpush1.bf16.msra.mxu1 %v3551_v44  ;;  %v3605_v42 = vld [vmem:[#allocation14 + $0x70] ss:$8 sps:$4 sm:$0xff]   ;;  %v3610_v44 = vld [vmem:[#allocation14 + $0x84] ss:$8 sps:$4 sm:$0xff]  }
 0x267   :  { %2011 = vmatprep.subr.bf16.mxu0 %v3556_v45  ;;  %2052 = vmatprep.subr.bf16.mxu1 %v3559_v46  ;;  %v3608_v45 = vld [vmem:[#allocation14 + $0x80] ss:$8 sps:$4 sm:$0xff]   ;;  %v3613_v46 = vld [vmem:[#allocation14 + $0x94] ss:$8 sps:$4 sm:$0xff]  }
 0x26a   :  { %2012 = vmatpush1.bf16.msra.mxu0 %v3554_v47  ;;  %2053 = vmatpush1.bf16.msra.mxu1 %v3557_v48  ;;  %v3611_v47 = vld [vmem:[#allocation14 + $0x90] ss:$8 sps:$4 sm:$0xff]   ;;  %v3616_v48 = vld [vmem:[#allocation14 + $0xa4] ss:$8 sps:$4 sm:$0xff]  }
 0x26b   :  { %2013 = vmatprep.subr.bf16.mxu0 %v3562_v49  ;;  %2054 = vmatprep.subr.bf16.mxu1 %v3565_v50  ;;  %v3614_v49 = vld [vmem:[#allocation14 + $0xa0] ss:$8 sps:$4 sm:$0xff]   ;;  %v3619_v50 = vld [vmem:[#allocation14 + $0xb4] ss:$8 sps:$4 sm:$0xff]  }
 0x26e   :  { %2014 = vmatpush1.bf16.msra.mxu0 %v3560_v51  ;;  %2055 = vmatpush1.bf16.msra.mxu1 %v3563_v52  ;;  %v3617_v51 = vld [vmem:[#allocation14 + $0xb0] ss:$8 sps:$4 sm:$0xff]   ;;  %v3622_v52 = vld [vmem:[#allocation14 + $0xc4] ss:$8 sps:$4 sm:$0xff]  }
 0x26f   :  { %2015 = vmatprep.subr.bf16.mxu0 %v3568_v53  ;;  %2056 = vmatprep.subr.bf16.mxu1 %v3571_v54  ;;  %v3620_v53 = vld [vmem:[#allocation14 + $0xc0] ss:$8 sps:$4 sm:$0xff]   ;;  %v3625_v54 = vld [vmem:[#allocation14 + $0xd4] ss:$8 sps:$4 sm:$0xff]  }
 0x272   :  { %2016 = vmatpush1.bf16.msra.mxu0 %v3566_v55  ;;  %2057 = vmatpush1.bf16.msra.mxu1 %v3569_v58  ;;  %v3623_v55 = vld [vmem:[#allocation14 + $0xd0] ss:$8 sps:$4 sm:$0xff]   ;;  %v3628_v58 = vld [vmem:[#allocation14 + $0xe4] ss:$8 sps:$4 sm:$0xff]  }
 0x273   :  { %2017 = vmatprep.subr.bf16.mxu0 %v3574_v59  ;;  %2058 = vmatprep.subr.bf16.mxu1 %v3577_v60  ;;  %v3626_v59 = vld [vmem:[#allocation14 + $0xe0] ss:$8 sps:$4 sm:$0xff]   ;;  %v3631_v60 = vld [vmem:[#allocation14 + $0xf4] ss:$8 sps:$4 sm:$0xff]  }
 0x276   :  { %2018 = vmatpush1.bf16.msra.mxu0 %v3572_v61  ;;  %2059 = vmatpush1.bf16.msra.mxu1 %v3575_v62  ;;  %v3629_v61 = vld [vmem:[#allocation14 + $0xf0] ss:$8 sps:$4 sm:$0xff]   ;;  %v3634_v62 = vld [vmem:[#allocation14 + $0x104] ss:$8 sps:$4 sm:$0xff]  }
 0x277   :  { %2019 = vmatprep.subr.bf16.mxu0 %v3580_v63  ;;  %2060 = vmatprep.subr.bf16.mxu1 %v3583_v2  ;;  %v3680_v63 = vld [vmem:[#allocation17 + $0x40] sm:$0xff]  }
 0x278   :  { %v3681_v2 = vld [vmem:[#allocation17] sm:$0xff]  }
 0x27a   :  { %2020 = vmatpush1.bf16.msra.mxu0 %v3578_v3  ;;  %2061 = vmatpush1.bf16.msra.mxu1 %v3581_v4  ;;  %v3682_v3 = vld [vmem:[#allocation17 + $0x48] sm:$0xff]  }
 0x27b   :  { %2475 = vmatprep.subr.bf16.mxu0 %v3586_v5  ;;  %3202 = vmatprep.subr.bf16.mxu1 %v3680_v63  ;;  %v3683_v4 = vld [vmem:[#allocation17 + $0x8] sm:$0xff]   ;;  %v3684_v5 = vld [vmem:[#allocation17 + $0x50] sm:$0xff]  }
 0x27c   :  { %v3676_v63 = vld [vmem:[#allocation14 + $0x1e4] ss:$8 sps:$4 sm:$0xff]  }
 0x310   :  { %v1488_v8 = vpop.f32.mrb[0].mxu0  ;;  %v1570_v9 = vpop.f32.mrb[16].mxu1 }
 0x311   :  { %v3253_v10 = vadd.f32 %v1488_v8, %v756_v7  ;;  %v3255_v11 = vadd.f32 %v1570_v9, %v764_v56  ;;  %v1490_v12 = vpop.f32.mrb[1].mxu0  ;;  %v1572_v13 = vpop.f32.mrb[17].mxu1  ;;  %v3686_v7 = vld [vmem:[#allocation17 + $0x58] sm:$0xff]   ;;  %v3690_v8 = vld [vmem:[#allocation17 + $0x68] sm:$0xff]  }
 0x312   :  { %v3254_v14 = vadd.f32 %v1490_v12, %v760_v57  ;;  %v3256_v16 = vadd.f32 %v1572_v13, %v768_v1  ;;  %v1492_v17 = vpop.f32.mrb[2].mxu0  ;;  %v1574_v19 = vpop.f32.mrb[18].mxu1  ;;  %v3687_v56 = vld [vmem:[#allocation17 + $0x18] sm:$0xff]   ;;  %v3688_v57 = vld [vmem:[#allocation17 + $0x60] sm:$0xff]   ;;  %v3691_v9 = vld [vmem:[#allocation17 + $0x28] sm:$0xff]  }
 0x313   :  { %v1577_v0 = vmax.f32 %v3253_v10, %v3255_v11  ;;  %v1493_v20 = vpop.f32.mrb[3].mxu0  ;;  %v1575_v21 = vpop.f32.mrb[19].mxu1  ;;  %v3689_v1 = vld [vmem:[#allocation17 + $0x20] sm:$0xff]   ;;  %v4332_v10 = vld [vmem:[#allocation13] sm:$0xf] }
 0x314   :  { %v1578_v22 = vmax.f32 %v3254_v14, %v3256_v16  ;;  %v1652_v11 = vrot.slane %v4332_v10, %v4306_v15  ;;  %v1656_v12 = vrot.slane %v4332_v10, %v4308_v18  ;;  %v1664_v13 = vrot.slane %v4332_v10, %v4314_v43 }
 0x315   :  { %v1579_v23 = vmax.f32 %v1577_v0, 0.0 }
 0x316   :  { %v1580_v24 = vmax.f32 %v1578_v22, 0.0 }
 0x317   :  { %v1581_v27 = vpack.c.bf16 %v1579_v23, %v1579_v23 }
 0x318   :  { %v1582_v26 = vpack.c.bf16 %v1580_v24, %v1580_v24 }
 0x31a   :  { %2021 = vmatprep.mubr.bf16.mxu0 %v1582_v26  ;;  %2062 = vmatprep.mubr.bf16.mxu1 %v1582_v26 }
 0x31b   :  { %2022 = vmatmul.mubr.bf16.vlgmr.msra.gmra.mrb[4].mxu0 %v1581_v27  ;;  %2063 = vmatmul.mubr.bf16.vlgmr.msra.gmra.mrb[20].mxu1 %v1581_v27 }
 0x31c   :  { %2476 = vmatpush1.bf16.msra.mxu0 %v3584_v25  ;;  %3203 = vmatpush3.bf16.msra.mxu1 %v3681_v2  ;;  %v3674_v2 = vld [vmem:[#allocation14 + $0x1e0] ss:$8 sps:$4 sm:$0xff]  }
 0x31d   :  { %2477 = vmatprep.subr.bf16.mxu0 %v3589_v28  ;;  %3204 = vmatprep.subr.bf16.mxu1 %v3682_v3 }
 0x320   :  { %2478 = vmatpush1.bf16.msra.mxu0 %v3587_v29  ;;  %3205 = vmatpush3.bf16.msra.mxu1 %v3683_v4  ;;  %v3679_v4 = vld [vmem:[#allocation14 + $0x1f4] ss:$8 sps:$4 sm:$0xff]  }
 0x321   :  { %2479 = vmatprep.subr.bf16.mxu0 %v3592_v30  ;;  %3206 = vmatprep.subr.bf16.mxu1 %v3684_v5  ;;  %v3632_v30 = vld [vmem:[#allocation14 + $0x100] ss:$8 sps:$4 sm:$0xff]   ;;  %v3677_v5 = vld [vmem:[#allocation14 + $0x1f0] ss:$8 sps:$4 sm:$0xff]  }
 0x324   :  { %2480 = vmatpush1.bf16.msra.mxu0 %v3590_v31  ;;  %3207 = vmatpush3.bf16.msra.mxu1 %v3685_v6 }
 0x325   :  { %2481 = vmatprep.subr.bf16.mxu0 %v3595_v32  ;;  %3208 = vmatprep.subr.bf16.mxu1 %v3686_v7  ;;  %v3637_v32 = vld [vmem:[#allocation14 + $0x114] ss:$8 sps:$4 sm:$0xff]  }
 0x328   :  { %2482 = vmatpush1.bf16.msra.mxu0 %v3593_v33  ;;  %3209 = vmatpush3.bf16.msra.mxu1 %v3687_v56  ;;  %v3635_v33 = vld [vmem:[#allocation14 + $0x110] ss:$8 sps:$4 sm:$0xff]  }
 0x329   :  { %2483 = vmatprep.subr.bf16.mxu0 %v3598_v34  ;;  %3210 = vmatprep.subr.bf16.mxu1 %v3688_v57  ;;  %v3640_v34 = vld [vmem:[#allocation14 + $0x124] ss:$8 sps:$4 sm:$0xff]   ;;  %v3692_v56 = vld [vmem:[#allocation17 + $0x70] sm:$0xff]  }
 0x32a   :  { %v3693_v57 = vld [vmem:[#allocation17 + $0x30] sm:$0xff]  }
 0x32c   :  { %2484 = vmatpush1.bf16.msra.mxu0 %v3596_v35  ;;  %3211 = vmatpush3.bf16.msra.mxu1 %v3689_v1  ;;  %v3638_v35 = vld [vmem:[#allocation14 + $0x120] ss:$8 sps:$4 sm:$0xff]  }
 0x32d   :  { %2485 = vmatprep.subr.bf16.mxu0 %v3601_v36  ;;  %3212 = vmatprep.subr.bf16.mxu1 %v3690_v8  ;;  %v3643_v36 = vld [vmem:[#allocation14 + $0x134] ss:$8 sps:$4 sm:$0xff]   ;;  %v4054_v8 = vmov 0.0  }
 0x32e   :  { %v3695_v1 = vld [vmem:[#allocation17 + $0x38] sm:$0xff]  }
 0x330   :  { %2486 = vmatpush1.bf16.msra.mxu0 %v3599_v37  ;;  %3213 = vmatpush3.bf16.msra.mxu1 %v3691_v9  ;;  %v3641_v37 = vld [vmem:[#allocation14 + $0x130] ss:$8 sps:$4 sm:$0xff]   ;;  %v2143_v9 = vld [vmem:[#allocation16] sm:$0x3] }
 0x331   :  { %2487 = vmatprep.subr.bf16.mxu0 %v3604_v39  ;;  %v3646_v39 = vld [vmem:[#allocation14 + $0x144] ss:$8 sps:$4 sm:$0xff]   ;;  %3214 = vmatprep.subr.bf16.mxu1 %v3692_v56 }
 0x334   :  { %2488 = vmatpush1.bf16.msra.mxu0 %v3602_v40  ;;  %v3644_v40 = vld [vmem:[#allocation14 + $0x140] ss:$8 sps:$4 sm:$0xff]   ;;  %3215 = vmatpush3.bf16.msra.mxu1 %v3693_v57 }
 0x335   :  { %2489 = vmatprep.subr.bf16.mxu0 %v3607_v41  ;;  %v3649_v41 = vld [vmem:[#allocation14 + $0x154] ss:$8 sps:$4 sm:$0xff]  }
 0x338   :  { %2490 = vmatpush1.bf16.msra.mxu0 %v3605_v42  ;;  %v3647_v42 = vld [vmem:[#allocation14 + $0x150] ss:$8 sps:$4 sm:$0xff]  }
 0x339   :  { %2491 = vmatprep.subr.bf16.mxu0 %v3610_v44  ;;  %v3652_v44 = vld [vmem:[#allocation14 + $0x164] ss:$8 sps:$4 sm:$0xff]  }
 0x33c   :  { %2492 = vmatpush1.bf16.msra.mxu0 %v3608_v45  ;;  %v3650_v45 = vld [vmem:[#allocation14 + $0x160] ss:$8 sps:$4 sm:$0xff]  }
 0x33d   :  { %2493 = vmatprep.subr.bf16.mxu0 %v3613_v46  ;;  %v3655_v46 = vld [vmem:[#allocation14 + $0x174] ss:$8 sps:$4 sm:$0xff]  }
 0x340   :  { %2494 = vmatpush1.bf16.msra.mxu0 %v3611_v47  ;;  %v3653_v47 = vld [vmem:[#allocation14 + $0x170] ss:$8 sps:$4 sm:$0xff]  }
 0x341   :  { %2495 = vmatprep.subr.bf16.mxu0 %v3616_v48  ;;  %v3658_v48 = vld [vmem:[#allocation14 + $0x184] ss:$8 sps:$4 sm:$0xff]  }
 0x344   :  { %2496 = vmatpush1.bf16.msra.mxu0 %v3614_v49  ;;  %v3656_v49 = vld [vmem:[#allocation14 + $0x180] ss:$8 sps:$4 sm:$0xff]  }
 0x345   :  { %2497 = vmatprep.subr.bf16.mxu0 %v3619_v50  ;;  %v3661_v50 = vld [vmem:[#allocation14 + $0x194] ss:$8 sps:$4 sm:$0xff]  }
 0x348   :  { %2498 = vmatpush1.bf16.msra.mxu0 %v3617_v51  ;;  %v3659_v51 = vld [vmem:[#allocation14 + $0x190] ss:$8 sps:$4 sm:$0xff]  }
 0x349   :  { %2499 = vmatprep.subr.bf16.mxu0 %v3622_v52  ;;  %v3664_v52 = vld [vmem:[#allocation14 + $0x1a4] ss:$8 sps:$4 sm:$0xff]  }
 0x34c   :  { %2500 = vmatpush1.bf16.msra.mxu0 %v3620_v53  ;;  %v3662_v53 = vld [vmem:[#allocation14 + $0x1a0] ss:$8 sps:$4 sm:$0xff]  }
 0x34d   :  { %2501 = vmatprep.subr.bf16.mxu0 %v3625_v54  ;;  %v3667_v54 = vld [vmem:[#allocation14 + $0x1b4] ss:$8 sps:$4 sm:$0xff]  }
 0x350   :  { %2502 = vmatpush1.bf16.msra.mxu0 %v3623_v55  ;;  %v3665_v55 = vld [vmem:[#allocation14 + $0x1b0] ss:$8 sps:$4 sm:$0xff]  }
 0x351   :  { %2503 = vmatprep.subr.bf16.mxu0 %v3628_v58  ;;  %v3670_v58 = vld [vmem:[#allocation14 + $0x1c4] ss:$8 sps:$4 sm:$0xff]  }
 0x354   :  { %2504 = vmatpush1.bf16.msra.mxu0 %v3626_v59  ;;  %v3668_v59 = vld [vmem:[#allocation14 + $0x1c0] ss:$8 sps:$4 sm:$0xff]  }
 0x355   :  { %2505 = vmatprep.subr.bf16.mxu0 %v3631_v60  ;;  %v3673_v60 = vld [vmem:[#allocation14 + $0x1d4] ss:$8 sps:$4 sm:$0xff]  }
 0x358   :  { %2506 = vmatpush1.bf16.msra.mxu0 %v3629_v61  ;;  %v3671_v61 = vld [vmem:[#allocation14 + $0x1d0] ss:$8 sps:$4 sm:$0xff]  }
 0x359   :  { %2516 = vmatprep.subr.bf16.mxu0 %v3634_v62  ;;  %v1660_v62 = vrot.slane %v4332_v10, %v4312_v38  ;;  %v3694_v38 = vld [vmem:[#allocation17 + $0x78] sm:$0xff]   ;;  %v2148_v10 = vrot.slane %v2143_v9, %v4306_v15 }
 0x35a   :  { %3216 = vmatprep.subr.bf16.mxu1 %v3694_v38  ;;  %v3698_v15 = vld [vmem:[#allocation20 + $0x10] sm:$0xff]  }
 0x35b   :  { %3217 = vmatpush3.bf16.msra.mxu1 %v3695_v1 }
 0x35c   :  { %3233 = vmatprep.subr.bf16.mxu1 %v4054_v8 }
 0x3ee   :  { %v2023_v14 = vpop.f32.mrb[4].mxu0  ;;  %v4340_v16 = vpop.f32.mrb[20].mxu1 }
 0x3ef   :  { %v2024_v17 = vadd.f32 %v2023_v14, %v1652_v11  ;;  %v2025_v19 = vpop.f32.mrb[5].mxu0  ;;  %v2066_v0 = vpop.f32.mrb[21].mxu1  ;;  %v2065_v3 = vadd.f32 %v4340_v16, %v1660_v62  ;;  %v2152_v11 = vrot.slane %v2143_v9, %v4308_v18  ;;  %v3699_v18 = vld [vmem:[#allocation20 + $0x18] sm:$0xff]  }
 0x3f0   :  { %v2026_v20 = vadd.f32 %v2025_v19, %v1656_v12  ;;  %v2067_v21 = vadd.f32 %v2066_v0, %v1664_v13  ;;  %v2027_v22 = vpop.f32.mrb[6].mxu0  ;;  %v2068_v23 = vpop.f32.mrb[22].mxu1 }
 0x3f1   :  { %v2071_v24 = vmax.f32 %v2024_v17, 0.0  ;;  %v2028_v26 = vpop.f32.mrb[7].mxu0  ;;  %v2069_v25 = vpop.f32.mrb[23].mxu1  ;;  %v2073_v6 = vmax.f32 %v2065_v3, 0.0  ;;  %v3696_v22 = vld [vmem:[#allocation20] sm:$0xff]  }
 0x3f2   :  { %v2072_v27 = vmax.f32 %v2026_v20, 0.0  ;;  %v2074_v28 = vmax.f32 %v2067_v21, 0.0  ;;  %v3700_v26 = vld [vmem:[#allocation20 + $0x20] sm:$0xff]   ;;  %v3701_v25 = vld [vmem:[#allocation20 + $0x28] sm:$0xff]  }
 0x3f3   :  { %v2075_v31 = vpack.c.bf16 %v2071_v24, %v2071_v24  ;;  %v2077_v7 = vpack.c.bf16 %v2073_v6, %v2073_v6  ;;  %v3697_v24 = vld [vmem:[#allocation20 + $0x8] sm:$0xff]  }
 0x3f4   :  { %v2076_v29 = vpack.c.bf16 %v2072_v27, %v2072_v27  ;;  %v2078_v43 = vpack.c.bf16 %v2074_v28, %v2074_v28  ;;  %v3702_v27 = vld [vmem:[#allocation20 + $0x30] sm:$0xff]   ;;  %v3703_v28 = vld [vmem:[#allocation20 + $0x38] sm:$0xff]  }
 0x3f6   :  { %2507 = vmatprep.mubr.bf16.mxu0 %v2076_v29 }
 0x3f7   :  { %2508 = vmatmul.mubr.bf16.vlgmr.msra.gmra.mrb[8].mxu0 %v2075_v31 }
 0x3f8   :  { %2517 = vmatpush1.bf16.msra.mxu0 %v3632_v30  ;;  %2548 = vmatprep.mubr.bf16.mxu0 %v2078_v43  ;;  %v3176_v30 = vld [vmem:[#allocation19] ss:$0 sm:$0xff] }
 0x3f9   :  { %2518 = vmatprep.subr.bf16.mxu0 %v3637_v32 }
 0x3fc   :  { %2519 = vmatpush1.bf16.msra.mxu0 %v3635_v33 }
 0x3fd   :  { %2520 = vmatprep.subr.bf16.mxu0 %v3640_v34 }
 0x400   :  { %2521 = vmatpush1.bf16.msra.mxu0 %v3638_v35 }
 0x401   :  { %2522 = vmatprep.subr.bf16.mxu0 %v3643_v36 }
 0x404   :  { %2523 = vmatpush1.bf16.msra.mxu0 %v3641_v37  ;;  %v3193_v37 = vld [vmem:[#allocation22] ss:$0 sm:$0xff] }
 0x405   :  { %2524 = vmatprep.subr.bf16.mxu0 %v3646_v39 }
 0x408   :  { %2525 = vmatpush1.bf16.msra.mxu0 %v3644_v40 }
 0x409   :  { %2526 = vmatprep.subr.bf16.mxu0 %v3649_v41 }
 0x40c   :  { %2527 = vmatpush1.bf16.msra.mxu0 %v3647_v42 }
 0x40d   :  { %2528 = vmatprep.subr.bf16.mxu0 %v3652_v44 }
 0x410   :  { %2529 = vmatpush1.bf16.msra.mxu0 %v3650_v45 }
 0x411   :  { %2530 = vmatprep.subr.bf16.mxu0 %v3655_v46 }
 0x414   :  { %2531 = vmatpush1.bf16.msra.mxu0 %v3653_v47 }
 0x415   :  { %2532 = vmatprep.subr.bf16.mxu0 %v3658_v48 }
 0x418   :  { %2533 = vmatpush1.bf16.msra.mxu0 %v3656_v49 }
 0x419   :  { %2534 = vmatprep.subr.bf16.mxu0 %v3661_v50 }
 0x41c   :  { %2535 = vmatpush1.bf16.msra.mxu0 %v3659_v51 }
 0x41d   :  { %2536 = vmatprep.subr.bf16.mxu0 %v3664_v52 }
 0x420   :  { %2537 = vmatpush1.bf16.msra.mxu0 %v3662_v53 }
 0x421   :  { %2538 = vmatprep.subr.bf16.mxu0 %v3667_v54 }
 0x424   :  { %2539 = vmatpush1.bf16.msra.mxu0 %v3665_v55 }
 0x425   :  { %2540 = vmatprep.subr.bf16.mxu0 %v3670_v58 }
 0x428   :  { %2541 = vmatpush1.bf16.msra.mxu0 %v3668_v59 }
 0x429   :  { %2542 = vmatprep.subr.bf16.mxu0 %v3673_v60 }
 0x42c   :  { %2543 = vmatpush1.bf16.msra.mxu0 %v3671_v61 }
 0x42d   :  { %2544 = vmatprep.subr.bf16.mxu0 %v3676_v63 }
 0x430   :  { %2545 = vmatpush1.bf16.msra.mxu0 %v3674_v2 }
 0x431   :  { %2546 = vmatprep.subr.bf16.mxu0 %v3679_v4 }
 0x434   :  { %2547 = vmatpush1.bf16.msra.mxu0 %v3677_v5 }
 0x437   :  { %2549 = vmatmul.mubr.bf16.vlgmr.msra.gmra.mrb[8].mxu0 %v2077_v7 }
 0x50a   :  { %v2550_v12 = vpop.f32.mrb[8].mxu0 }
 0x50b   :  { %v3257_v13 = vadd.f32 %v2550_v12, %v2148_v10  ;;  %v2552_v14 = vpop.f32.mrb[9].mxu0 }
 0x50c   :  { %v3258_v16 = vadd.f32 %v2552_v14, %v2152_v11  ;;  %v2554_v17 = vpop.f32.mrb[10].mxu0 }
 0x50d   :  { %v2557_v19 = vmax.f32 %v3257_v13, 0.0  ;;  %v2555_v0 = vpop.f32.mrb[11].mxu0 }
 0x50e   :  { %v2558_v20 = vmax.f32 %v3258_v16, 0.0 }
 0x50f   :  { %v2559_v23 = vpack.c.bf16 %v2557_v19, %v2557_v19 }
 0x510   :  { %v2560_v21 = vpack.c.bf16 %v2558_v20, %v2558_v20 }
 0x512   :  { %2728 = vmatprep.mubr.bf16.mxu1 %v2560_v21 }
 0x513   :  { %2729 = vmatmul.mubr.bf16.vlgmr.msra.gmra.mrb[24].mxu1 %v2559_v23 }
 0x514   :  { %3234 = vmatpush3.bf16.msra.mxu1 %v3696_v22  ;;  %3249 = vmatprep.mubr.msk.bf16.mxu1 %vm4055_vm1, %v4054_v8 }
 0x515   :  { %3235 = vmatprep.subr.bf16.mxu1 %v4054_v8 }
 0x518   :  { %3236 = vmatpush3.bf16.msra.mxu1 %v3697_v24 }
 0x519   :  { %3237 = vmatprep.subr.bf16.mxu1 %v4054_v8 }
 0x51c   :  { %3238 = vmatpush3.bf16.msra.mxu1 %v3698_v15 }
 0x51d   :  { %3239 = vmatprep.subr.bf16.mxu1 %v4054_v8 }
 0x520   :  { %3240 = vmatpush3.bf16.msra.mxu1 %v3699_v18 }
 0x521   :  { %3241 = vmatprep.subr.bf16.mxu1 %v4054_v8 }
 0x524   :  { %3242 = vmatpush3.bf16.msra.mxu1 %v3700_v26 }
 0x525   :  { %3243 = vmatprep.subr.bf16.mxu1 %v4054_v8 }
 0x528   :  { %3244 = vmatpush3.bf16.msra.mxu1 %v3701_v25 }
 0x529   :  { %3245 = vmatprep.subr.bf16.mxu1 %v4054_v8 }
 0x52c   :  { %3246 = vmatpush3.bf16.msra.mxu1 %v3702_v27 }
 0x52d   :  { %3247 = vmatprep.subr.bf16.mxu1 %v4054_v8 }
 0x530   :  { %3248 = vmatpush3.bf16.msra.mxu1 %v3703_v28 }
 0x5e6   :  { %v3218_v29 = vpop.f32.mrb[24].mxu1 }
 0x5e7   :  { %v3219_v31 = vpop.f32.mrb[25].mxu1 }
 0x5e8   :  { %v3220_v32 = vadd.f32 %v3219_v31, %v3218_v29  ;;  %v3221_v43 = vpop.f32.mrb[26].mxu1 }
 0x5e9   :  { %v3222_v33 = vpop.f32.mrb[27].mxu1 }
 0x5ea   :  { %v2731_v34 = vadd.f32 %v3220_v32, %v3176_v30 }
 0x5ec   :  { %v2736_v35 = vmax.f32 %v2731_v34, 0.0 }
 0x5ee   :  { %v2737_v36 = vpack.c.bf16 %v2736_v35, %v2736_v35 }
 0x5f0   :  { %3250 = vmatmul.mubr.bf16.vlgmr.msra.gmra.mrb[28].mxu1 %v2737_v36 }
 0x6c3   :  { %v2843_v39 = vpop.f32.mrb[28].mxu1 }
 0x6c4   :  { %v2844_v40 = vadd.f32 %v3193_v37, %v2843_v39  ;;  %v3251_v41 = vpop.f32.mrb[29].mxu1 }
 0x6c5   :  { %v2846_v42 = vpop.f32.mrb[30].mxu1 }
 0x6c6   :  { %v3252_v44 = vpop.f32.mrb[31].mxu1  ;;  %v2850_v45 = vsel %vm2849_vm2, %v2844_v40, -inf }
 0x6c7   :  { %2851 = vmax.xlane.f32.xlu0 %v2850_v45 }
 0x754   :  { %v2852_v46 = vpop.xlane.xlu0 %2851 }
 0x755   :  { %v2853_v47 = vsub.f32 %v2844_v40, %v2852_v46 }
 0x757   :  { %v2854_v48 = vmul.f32 1.442695, %v2853_v47 }
 0x759   :  { %3704 = vpow2.f32 %v2854_v48 }
 0x763   :  { %v3705_v49 = vpop.eup %3704 }
 0x764   :  { %v2856_v50 = vsel %vm2849_vm2, %v3705_v49, 0.0 }
 0x765   :  { %2857 = vadd.xlane.f32.xlu0 %v2856_v50 }
 0x7f2   :  { %v2858_v51 = vpop.xlane.xlu0 %2857 }
 0x7f3   :  { %3706 = vlog2.f32 %v2858_v51 }
 0x7fd   :  { %v3707_v52 = vpop.eup %3706 }
 0x7fe   :  { %v2860_v53 = vmul.f32 0.6931472, %v3707_v52 }
 0x800   :  { %v2861_v54 = vsub.f32 %v2853_v47, %v2860_v53 }
 0x802   :  { %2862 = vst [vmem:[#allocation23] sm:$0x3] %v2861_v54 }
 0x803   :  { %4005 = shalt.err (!%p4002_p10)
}
 0x804   :  { %s4006_s2 = scalar_lea.hbm %s4372_s13, 32 }
 0x805   :  { %p4007_p11 = scmp.ne.s32.totalorder %s4372_s13, %s4006_s2  ;;  %p4010_p12 = scmp.lt.u32.totalorder %s4006_s2, %s4372_s13 }
 0x807   :  { %p4012_p13 = pnand %p4010_p12, %p4007_p11 }
 0x809   :  { %4015 = shalt.err (!%p4012_p13)
}
 0x80a   :  { %2872 = dma.vmem_to_hbm [thread:$0]  %s2870_s22, 32, %s4372_s13, [#allocation4]  }
 0x80b   :  { %4030 = dma.done.wait [#allocation4], 32  }
 0x80c   :  { %4031 = vsyncadd [#allocation4], 4294967264 }
 0x80d   :  { %2876 = vsyncpa [#allocation3], 1 }
 0x80e   :  { %2877 = vsyncpa [#allocation6], 1 }
 0x80f   :  { %2878 = vsyncpa [#allocation9], 1 }
 0x810   :  { %2879 = vsyncpa [#allocation12], 1 }
 0x811   :  { %2880 = vsyncpa [#allocation15], 1 }
 0x812   :  { %2881 = vsyncpa [#allocation18], 1 }
 0x813   :  { %2882 = vsyncpa [#allocation21], 1 }
 0x814   :  { %2883 = vsyncpa [#allocation4], 1 }

</bundles_post_ra>
